<compile_context>
chip_gen: v7x
topology: tpu7x:2x2x1
jax: 0.10.0
libtpu: 0.0.40
codegen_flags: <defaults>
</compile_context>

<pallas_src>
import math
from functools import partial

import jax
import jax.numpy as jnp
from jax.experimental import pallas as pl
from jax.experimental.pallas import tpu as pltpu

F32 = jnp.float32
BF16 = jnp.bfloat16

# 48 MiB: leaves double-buffering headroom on v5e/v6e (128 MiB VMEM) and stays
# inside v7x's 64 MiB physical VMEM.
_VMEM_LIMIT = 48 * 1024 * 1024
_MM_PARAMS = pltpu.CompilerParams(
    dimension_semantics=("parallel", "arbitrary"),
    vmem_limit_bytes=_VMEM_LIMIT,
)


# --------------------------------------------------------------------------
# Fused matmul Pallas kernel:  act/epilogue(a @ w + b [, extras])
# --------------------------------------------------------------------------
def _round_up(x, m):
    return (x + m - 1) // m * m


def _choose_tm(M):
    """Large M tile; prefer a divisor of M (no pad copy), >=2 blocks if big."""
    if M < 512:
        return _round_up(M, 8)
    hi = min(512, _round_up(M // 2, 8))
    for tm in range(hi, 127, -8):
        if M % tm == 0:
            return tm
    return hi


def _choose_tk(K):
    """K tile: multiple of 128 that divides K, <=1024; else no K tiling."""
    if K <= 1024 or K % 128 != 0:
        return K
    for d in range(8, 0, -1):
        tk = 128 * d
        if K % tk == 0:
            return tk
    return K


def _apply_act(x, act):
    if act == "relu":
        return jnp.maximum(x, 0.0)
    if act == "leaky":                      # LeakyReLU(0.2) as in the reference
        return jnp.where(x >= 0, x, 0.2 * x)
    return x


def _mm_kernel(*refs, act, epilogue, n_extra):
    a_ref, w_ref, b_ref = refs[0], refs[1], refs[2]
    extras = refs[3:3 + n_extra]
    o_ref = refs[3 + n_extra]
    acc_ref = refs[4 + n_extra]

    k = pl.program_id(1)

    @pl.when(k == 0)
    def _():
        acc_ref[...] = jnp.zeros_like(acc_ref)

    acc_ref[...] += jnp.dot(a_ref[...], w_ref[...],
                            preferred_element_type=jnp.float32)

    @pl.when(k == pl.num_programs(1) - 1)
    def _():
        y = acc_ref[...] + b_ref[...]
        if epilogue == "add":
            # residual add (+ optional activation): resnet / SR blocks
            y = _apply_act(y + extras[0][...], act)
        elif epilogue == "gate":
            # sigmoid(g_att) * (conv_mid_out + residual)
            y = jax.nn.sigmoid(extras[1][...]) * (y + extras[0][...])
        elif epilogue == "relu_affine":
            # (BN folded into weights) -> ReLU -> normalize_layer
            p = extras[0][...]
            y = jnp.maximum(y, 0.0) * p[0:1, :] + p[1:2, :]
        else:
            y = _apply_act(y, act)
        o_ref[...] = y


@partial(jax.jit, static_argnames=("act", "epilogue"))
def matmul_fused(a, w, b, *extras, act="none", epilogue="none"):
    """act/epilogue(a @ w + b).  a:(M,K)  w:(K,N)  b:(N,)  extras per-mode."""
    M, K = a.shape
    N = w.shape[1]

    a = a.astype(BF16)
    w = w.astype(BF16)
    b = b.astype(F32).reshape(1, N)

    TM = _choose_tm(M)
    Mp = _round_up(M, TM)
    TK = _choose_tk(K)
    nk = K // TK

    n_extra = len(extras)
    row_extra = epilogue in ("add", "gate")

    if Mp != M:
        a = jnp.pad(a, ((0, Mp - M), (0, 0)))
        if row_extra:
            extras = tuple(jnp.pad(e, ((0, Mp - M), (0, 0))) for e in extras)

    in_specs = [
        pl.BlockSpec((TM, TK), lambda i, k: (i, k)),
        pl.BlockSpec((TK, N), lambda i, k: (k, 0)),
        pl.BlockSpec((1, N), lambda i, k: (0, 0)),
    ]
    for e in extras:
        if row_extra:
            in_specs.append(pl.BlockSpec((TM, N), lambda i, k: (i, 0)))
        else:  # small (2, N) affine params for "relu_affine"
            in_specs.append(pl.BlockSpec(e.shape, lambda i, k: (0, 0)))

    out = pl.pallas_call(
        partial(_mm_kernel, act=act, epilogue=epilogue, n_extra=n_extra),
        out_shape=jax.ShapeDtypeStruct((Mp, N), F32),
        grid=(Mp // TM, nk),
        in_specs=in_specs,
        out_specs=pl.BlockSpec((TM, N), lambda i, k: (i, 0)),
        scratch_shapes=[pltpu.VMEM((TM, N), F32)],
        compiler_params=_MM_PARAMS,
    )(a, w, b, *extras)
    return out if Mp == M else out[:M]


# --------------------------------------------------------------------------
# Convolution = im2col glue (bf16) + fused Pallas matmul
# --------------------------------------------------------------------------
@partial(jax.jit, static_argnames=("stride", "padding", "act", "epilogue"))
def conv2d(x, w, b, *extras, stride=1, padding=0, act="none", epilogue="none"):
    """x: NHWC, w: (KH, KW, Cin, Cout) bf16, b: (Cout,)."""
    N, H, W, Cin = x.shape
    KH, KW, _, Cout = w.shape
    Ho = (H + 2 * padding - KH) // stride + 1
    Wo = (W + 2 * padding - KW) // stride + 1

    if KH == 1 and KW == 1 and stride == 1 and padding == 0:
        patches = x.reshape(N * H * W, Cin).astype(BF16)
    else:
        xp = jnp.pad(x, ((0, 0), (padding, padding),
                         (padding, padding), (0, 0))).astype(BF16)
        cols = []
        for kh in range(KH):
            for kw in range(KW):
                cols.append(jax.lax.slice(
                    xp, (0, kh, kw, 0),
                    (N, kh + (Ho - 1) * stride + 1,
                     kw + (Wo - 1) * stride + 1, Cin),
                    (1, stride, stride, 1)))
        patches = jnp.concatenate(cols, axis=-1).reshape(
            N * Ho * Wo, KH * KW * Cin)

    wm = w.reshape(KH * KW * Cin, Cout)
    ex2 = tuple(e.reshape(-1, e.shape[-1]) if e.ndim == 4 else e
                for e in extras)
    out = matmul_fused(patches, wm, b, *ex2, act=act, epilogue=epilogue)
    return out.reshape(N, Ho, Wo, Cout)


# --------------------------------------------------------------------------
# XLA glue (per perf review: avoid Pallas fixed-cost / stacked-tap HBM blowup)
# --------------------------------------------------------------------------
def maxpool2d(x, k, s, p=0):
    return jax.lax.reduce_window(
        x, jnp.array(-jnp.inf, x.dtype), jax.lax.max,
        window_dimensions=(1, k, k, 1),
        window_strides=(1, s, s, 1),
        padding=((0, 0), (p, p), (p, p), (0, 0)))


def upsample_bilinear(x, out_h, out_w):
    # matches F.interpolate(mode='bilinear', align_corners=False) for upsampling
    N, H, W, C = x.shape
    return jax.image.resize(x, (N, out_h, out_w, C), method="bilinear")


# --------------------------------------------------------------------------
# Deterministic parameter construction (weights stored in bf16 for the MXU)
# --------------------------------------------------------------------------
class ParamGen:
    def __init__(self, seed=0):
        self._key = jax.random.PRNGKey(seed)

    def key(self):
        self._key, k = jax.random.split(self._key)
        return k

    def conv(self, kh, kw, cin, cout):
        bound = 1.0 / math.sqrt(kh * kw * cin)
        w = jax.random.uniform(self.key(), (kh, kw, cin, cout), F32, -bound, bound)
        b = jax.random.uniform(self.key(), (cout,), F32, -bound, bound)
        return w.astype(BF16), b

    def linear(self, cin, cout):
        bound = 1.0 / math.sqrt(cin)
        w = jax.random.uniform(self.key(), (cin, cout), F32, -bound, bound)
        b = jax.random.uniform(self.key(), (cout,), F32, -bound, bound)
        return w.astype(BF16), b


_BN_EPS = 1e-5


def fold_bn(w, b):
    # eval-mode BatchNorm with default init (gamma=1, beta=0, rm=0, rv=1)
    s = 1.0 / math.sqrt(1.0 + _BN_EPS)
    return (w.astype(F32) * s).astype(BF16), b * s


def make_basic_block(pg, cin, cout, stride):
    p = {"stride": stride,
         "conv1": fold_bn(*pg.conv(3, 3, cin, cout)),
         "conv2": fold_bn(*pg.conv(3, 3, cout, cout)),
         "down": None}
    if stride != 1 or cin != cout:
        p["down"] = fold_bn(*pg.conv(1, 1, cin, cout))
    return p


def basic_block_fwd(p, x):
    s = p["stride"]
    idt = x
    if p["down"] is not None:
        idt = conv2d(x, *p["down"], stride=s, padding=0, act="none")
    y = conv2d(x, *p["conv1"], stride=s, padding=1, act="relu")
    # second conv + residual add + relu fused in the matmul epilogue
    return conv2d(y, *p["conv2"], idt, stride=1, padding=1,
                  act="relu", epilogue="add")


def make_layer(pg, cin, cout, nblocks, stride):
    blocks = [make_basic_block(pg, cin, cout, stride)]
    for _ in range(nblocks - 1):
        blocks.append(make_basic_block(pg, cout, cout, 1))
    return blocks


def layer_fwd(blocks, x):
    for b in blocks:
        x = basic_block_fwd(b, x)
    return x


def make_decoder(pg, cin, cmid, cout):
    return {"cr1": pg.conv(3, 3, cin, cmid), "cr2": pg.conv(3, 3, cmid, cout)}


def decoder_fwd(p, x):
    N, H, W, C = x.shape
    x = upsample_bilinear(x, 2 * H, 2 * W)
    x = conv2d(x, *p["cr1"], stride=1, padding=1, act="relu")
    x = conv2d(x, *p["cr2"], stride=1, padding=1, act="relu")
    return x


def make_attention_resnet(pg, in_ch, out_ch, nf=32):
    bot = 512
    return {
        "conv1": fold_bn(*pg.conv(7, 7, in_ch, 64)),
        "layer1": make_layer(pg, 64, 64, 3, 1),
        "layer2": make_layer(pg, 64, 128, 4, 2),
        "layer3": make_layer(pg, 128, 256, 6, 2),
        "layer4": make_layer(pg, 256, 512, 3, 2),
        "center": make_decoder(pg, bot, nf * 8 * 2, nf * 8),
        "dec5": make_decoder(pg, bot + nf * 8, nf * 8 * 2, nf * 8),
        "dec4": make_decoder(pg, bot // 2 + nf * 8, nf * 8 * 2, nf * 8),
        "dec3": make_decoder(pg, bot // 4 + nf * 8, nf * 4 * 2, nf * 2),
        "dec2": make_decoder(pg, bot // 8 + nf * 2, nf * 2 * 2, nf * 2 * 2),
        "dec1": make_decoder(pg, nf * 2 * 2, nf * 2 * 2, nf),
        "att_cr": pg.conv(3, 3, nf, nf),
        "att_1x1": pg.conv(1, 1, nf, out_ch),
    }


def attention_resnet_fwd(p, x):
    c1 = conv2d(x, *p["conv1"], stride=2, padding=3, act="relu")
    c1 = maxpool2d(c1, 2, 2, 0)
    c2 = layer_fwd(p["layer1"], c1)
    c3 = layer_fwd(p["layer2"], c2)
    c4 = layer_fwd(p["layer3"], c3)
    c5 = layer_fwd(p["layer4"], c4)
    pool = maxpool2d(c5, 2, 2, 0)
    center = decoder_fwd(p["center"], pool)
    d5 = decoder_fwd(p["dec5"], jnp.concatenate([center, c5], axis=-1))
    d4 = decoder_fwd(p["dec4"], jnp.concatenate([d5, c4], axis=-1))
    d3 = decoder_fwd(p["dec3"], jnp.concatenate([d4, c3], axis=-1))
    d2 = decoder_fwd(p["dec2"], jnp.concatenate([d3, c2], axis=-1))
    d1 = decoder_fwd(p["dec1"], d2)
    a = conv2d(d1, *p["att_cr"], stride=1, padding=1, act="relu")
    return conv2d(a, *p["att_1x1"], stride=1, padding=0, act="none")


def make_resnet18(pg, in_ch, num_classes):
    return {
        "conv1": fold_bn(*pg.conv(7, 7, in_ch, 64)),
        "layer1": make_layer(pg, 64, 64, 2, 1),
        "layer2": make_layer(pg, 64, 128, 2, 2),
        "layer3": make_layer(pg, 128, 256, 2, 2),
        "layer4": make_layer(pg, 256, 512, 2, 2),
        "fc": pg.linear(512, num_classes),
    }


def resnet18_fwd(p, x):
    y = conv2d(x, *p["conv1"], stride=2, padding=3, act="relu")
    y = maxpool2d(y, 3, 2, 1)
    for name in ("layer1", "layer2", "layer3", "layer4"):
        y = layer_fwd(p[name], y)
    y = jnp.mean(y, axis=(1, 2))                      # global average pool (glue)
    w, b = p["fc"]
    return matmul_fused(y, w, b, act="none", epilogue="none")


def make_ferattention(seed=0, num_classes=8, num_channels=3, num_filters=32):
    assert num_channels == 3, "normalize_layer requires 3 channels"
    pg = ParamGen(seed)
    p = {
        "attention": make_attention_resnet(pg, num_channels, num_classes, 32),
        "conv_input": pg.conv(9, 9, num_channels, num_classes),
        "feature": [(pg.conv(3, 3, num_classes, num_classes),
                     pg.conv(3, 3, num_classes, num_classes))
                    for _ in range(8)],
        "conv_mid": pg.conv(3, 3, num_classes, num_classes),
        "recon_cr": pg.conv(3, 3, 2 * num_classes + num_channels, num_filters),
        # conv2_bn (eval-mode, default stats) folded into the 1x1 weights
        "recon_1x1": fold_bn(*pg.conv(1, 1, num_filters, num_channels)),
        "netclass": make_resnet18(pg, num_channels, num_classes),
    }
    n_scale = jnp.array([0.2023 / 0.5, 0.1994 / 0.5, 0.201 / 0.5], F32)
    n_shift = jnp.array([(0.4914 - 0.5) / 0.5, (0.4822 - 0.5) / 0.5,
                         (0.4465 - 0.5) / 0.5], F32)
    p["post"] = jnp.stack([n_scale, n_shift], axis=0)       # (2, 3)
    return p


def ferattention_fwd(p, x_nchw):
    # NCHW (PyTorch convention) -> NHWC for the kernels
    x = jnp.transpose(x_nchw, (0, 2, 3, 1)).astype(F32)

    g_att = attention_resnet_fwd(p["attention"], x)          # (N, H, W, 8)

    out = conv2d(x, *p["conv_input"], stride=1, padding=4, act="none")
    residual = out
    for (c1, c2) in p["feature"]:                            # 8 SR blocks
        y = conv2d(out, *c1, stride=1, padding=1, act="leaky")
        out = conv2d(y, *c2, out, stride=1, padding=1,
                     act="none", epilogue="add")             # fused residual add
    # conv_mid + add(residual) + sigmoid(g_att) gate, fused in the epilogue
    attmap = conv2d(out, *p["conv_mid"], residual, g_att,
                    stride=1, padding=1, act="none", epilogue="gate")

    att = conv2d(jnp.concatenate([attmap, x, g_att], axis=-1),
                 *p["recon_cr"], stride=1, padding=1, act="relu")
    # 1x1 conv + folded BN + ReLU + normalize_layer, fused in the epilogue
    att_out = conv2d(att, *p["recon_1x1"], p["post"],
                     stride=1, padding=0, act="none", epilogue="relu_affine")

    att_pool = upsample_bilinear(att_out, 224, 224)          # resnet backcoder
    y = resnet18_fwd(p["netclass"], att_pool)
    return y                                                  # (N, num_classes)


if __name__ == "__main__":
    params = make_ferattention(seed=0, num_classes=8, num_channels=3,
                               num_filters=32)
    key = jax.random.PRNGKey(0)
    # FERAttentionNet has size_input = 64 (minimum spatial size for the U-Net)
    x = jax.random.uniform(key, (2, 3, 64, 64), F32)          # NCHW like PyTorch
    y = ferattention_fwd(params, x)
    y = jax.block_until_ready(y)
    assert y.shape == (2, 8), y.shape
    assert bool(jnp.all(jnp.isfinite(y)))
    print("KERNEL_OK")
</pallas_src>

<mosaic_0001>
module attributes {stable_mosaic.version = 11 : i64} {
  func.func @_mm_kernel(%arg0: i32, %arg1: i32, %arg2: memref<512x147xbf16, #tpu.memory_space<vmem>>, %arg3: memref<147x64xbf16, #tpu.memory_space<vmem>>, %arg4: memref<1x64xf32, #tpu.memory_space<vmem>>, %arg5: memref<512x64xf32, #tpu.memory_space<vmem>>, %arg6: memref<512x64xf32, #tpu.memory_space<vmem>>) attributes {dimension_semantics = [#tpu.dimension_semantics<parallel>, #tpu.dimension_semantics<arbitrary>], iteration_bounds = array<i64: 4, 1>, scalar_prefetch = 0 : i64, scratch_operands = 1 : i64, tpu.core_type = #tpu.core_type<tc>, window_params = [{transform_indices = @transform_0, window_bounds = array<i64: 512, 147>}, {transform_indices = @transform_1, window_bounds = array<i64: 147, 64>}, {pipeline_mode = #tpu.pipeline_mode<synchronous>, transform_indices = @transform_2, window_bounds = array<i64: 1, 64>}, {transform_indices = @transform_3, window_bounds = array<i64: 512, 64>}]} {
    %c0_i32 = arith.constant 0 : i32
    %0 = arith.cmpi eq, %arg1, %c0_i32 : i32
    %1 = arith.extui %0 : i1 to i32
    %c0_i32_0 = arith.constant 0 : i32
    %2 = arith.cmpi ne, %1, %c0_i32_0 : i32
    scf.if %2 {
      %cst_10 = arith.constant 0.000000e+00 : f32
      %12 = vector.broadcast %cst_10 : f32 to vector<512x64xf32>
      %c0_11 = arith.constant 0 : index
      %c0_12 = arith.constant 0 : index
      %13 = vector.load %arg6[%c0_11, %c0_12] : memref<512x64xf32, #tpu.memory_space<vmem>>, vector<512x64xf32>
      tpu.vector_store %arg6[%c0_11, %c0_12], %12 {strides = array<i32>} : memref<512x64xf32, #tpu.memory_space<vmem>>, vector<512x64xf32>,
    } else {
    }
    %c0 = arith.constant 0 : index
    %c0_1 = arith.constant 0 : index
    %3 = vector.load %arg6[%c0, %c0_1] : memref<512x64xf32, #tpu.memory_space<vmem>>, vector<512x64xf32>
    %c0_2 = arith.constant 0 : index
    %c0_3 = arith.constant 0 : index
    %4 = vector.load %arg2[%c0_2, %c0_3] : memref<512x147xbf16, #tpu.memory_space<vmem>>, vector<512x147xbf16>
    %c0_4 = arith.constant 0 : index
    %c0_5 = arith.constant 0 : index
    %5 = vector.load %arg3[%c0_4, %c0_5] : memref<147x64xbf16, #tpu.memory_space<vmem>>, vector<147x64xbf16>
    %cst = arith.constant dense<0.000000e+00> : vector<512x64xf32>
    %6 = tpu.matmul %4, %5, %cst {dimension_numbers = #tpu.dot_dimension_numbers<[1], [0], [0], [1], [0, 0, 1, 1], [], []>} : vector<512x147xbf16>, vector<147x64xbf16>, vector<512x64xf32> -> vector<512x64xf32>
    %7 = arith.addf %3, %6 : vector<512x64xf32>
    %c0_6 = arith.constant 0 : index
    %c0_7 = arith.constant 0 : index
    %8 = vector.load %arg6[%c0_6, %c0_7] : memref<512x64xf32, #tpu.memory_space<vmem>>, vector<512x64xf32>
    tpu.vector_store %arg6[%c0_6, %c0_7], %7 {strides = array<i32>} : memref<512x64xf32, #tpu.memory_space<vmem>>, vector<512x64xf32>,
    %c0_i32_8 = arith.constant 0 : i32
    %9 = arith.cmpi eq, %arg1, %c0_i32_8 : i32
    %10 = arith.extui %9 : i1 to i32
    %c0_i32_9 = arith.constant 0 : i32
    %11 = arith.cmpi ne, %10, %c0_i32_9 : i32
    scf.if %11 {
      %c0_10 = arith.constant 0 : index
      %c0_11 = arith.constant 0 : index
      %12 = vector.load %arg6[%c0_10, %c0_11] : memref<512x64xf32, #tpu.memory_space<vmem>>, vector<512x64xf32>
      %c0_12 = arith.constant 0 : index
      %c0_13 = arith.constant 0 : index
      %13 = vector.load %arg4[%c0_12, %c0_13] : memref<1x64xf32, #tpu.memory_space<vmem>>, vector<1x64xf32>
      %14 = vector.broadcast %13 : vector<1x64xf32> to vector<512x64xf32>
      %15 = arith.addf %12, %14 : vector<512x64xf32>
      %cst_14 = arith.constant 0.000000e+00 : f32
      %16 = vector.broadcast %cst_14 : f32 to vector<512x64xf32>
      %17 = arith.maximumf %15, %16 : vector<512x64xf32>
      %c0_15 = arith.constant 0 : index
      %c0_16 = arith.constant 0 : index
      %18 = vector.load %arg5[%c0_15, %c0_16] : memref<512x64xf32, #tpu.memory_space<vmem>>, vector<512x64xf32>
      tpu.vector_store %arg5[%c0_15, %c0_16], %17 {strides = array<i32>} : memref<512x64xf32, #tpu.memory_space<vmem>>, vector<512x64xf32>,
    } else {
    }
    return
  }
  func.func @transform_0(%arg0: i32, %arg1: i32) -> (i32, i32) {
    %c0_i32 = arith.constant 0 : i32
    return %arg0, %arg1 : i32, i32
  }
  func.func @transform_1(%arg0: i32, %arg1: i32) -> (i32, i32) {
    %c0_i32 = arith.constant 0 : i32
    %c0_i32_0 = arith.constant 0 : i32
    return %arg1, %c0_i32 : i32, i32
  }
  func.func @transform_2(%arg0: i32, %arg1: i32) -> (i32, i32) {
    %c0_i32 = arith.constant 0 : i32
    %c0_i32_0 = arith.constant 0 : i32
    %c0_i32_1 = arith.constant 0 : i32
    return %c0_i32, %c0_i32_0 : i32, i32
  }
  func.func @transform_3(%arg0: i32, %arg1: i32) -> (i32, i32) {
    %c0_i32 = arith.constant 0 : i32
    %c0_i32_0 = arith.constant 0 : i32
    return %arg0, %c0_i32 : i32, i32
  }
}

</mosaic_0001>

<bundles_post_ra>
// kernel: matmul_fused.1
= control target key start
LH: loop header
LB: loop body
LE: loop exit
PB: predicated region body
PF: predicated region fallthrough
CT: control target
= control target key end

     0   :  { %s1985_s12 = smov 0   ;;  %s1987_s13 = smov 0   ;;  %s2563_s0 = inlined_call_operand.vmem [shape: bf16[2048,147], index: 0, kind: input, shape index: {}]   ;;  %s2564_s1 = inlined_call_operand.vmem [shape: bf16[147,64], index: 1, kind: input, shape index: {}]   ;;  %s2565_s2 = inlined_call_operand.vmem [shape: f32[1,64], index: 2, kind: input, shape index: {}]   ;;  %s2566_s3 = inlined_call_operand.vmem [shape: f32[2048,64], index: 3, kind: output, shape index: {}]  }
   0x1   :  { %s1989_s14 = smov 0  }
   0x2 LB: > { %s25_s15 = sadd.s32 1, %s1956_s13  ;;  %p1668_p0 = scmp.ge.s32.totalorder %s1960_s14, 1  ;;  %s1960_s14 = sphi %s1989_s14, %s13_s14   ;;  %s1956_s13 = sphi %s1987_s13, %s2568_s13   ;;  %s1952_s12 = sphi %s1985_s12, %s2567_s12  }
   0x3   : > { %p27_p1 = scmp.ge.s32.totalorder %s25_s15, 4  ;;  %p169_p2 = scmp.lt.s32.totalorder %s1960_s14, 5 }
   0x5   : > { %s2570_s15 = smov (%p27_p1, %s25_s15), 0  ;;  %p170_p3 = pnand %p1668_p0, %p169_p2 }
   0x6   : > { %v1831_v0 = vld [vmem:[%s2564_s1] sm:$0xff] (!%p170_p3)   ;;  %v1962_v1 = vmov (!%p170_p3), 0   ;;  %v1832_v2 = vld [vmem:[%s2564_s1 + $0x8] sm:$0xff] (!%p170_p3)   ;;  %v1833_v3 = vld [vmem:[%s2564_s1 + $0x10] sm:$0xff] (!%p170_p3)   ;;  %s1669_s22 = sshll.u32 (!%p170_p3), %s1952_s12, 6  ;;  %vm789_vm0 = vcmask (!%p170_p3), 154624  }
   0x7   : > { %173 = sbr.rel (%p170_p3) target bundleno = 397 (0x18d), region = 32  ;;  %893 = vmatprep.subr.bf16.mxu0 (!%p170_p3), %v1962_v1  ;;  %1784 = vmatprep.subr.bf16.mxu1 (!%p170_p3), %v1962_v1  ;;  %p205_p4 = scmp.lt.s32.totalorder (!%p170_p3), %s1669_s22, 255  ;;  %v1834_v4 = vld [vmem:[%s2564_s1 + $0x18] sm:$0xff] (!%p170_p3)   ;;  %v1835_v5 = vld [vmem:[%s2564_s1 + $0x20] sm:$0xff] (!%p170_p3)   ;;  %v1836_v8 = vld [vmem:[%s2564_s1 + $0x28] sm:$0xff] (!%p170_p3)   ;;  %vm886_vm1 = vcmask (!%p170_p3), 1040384  }
   0x8   : > { %894 = vmatpush1.bf16.msra.mxu0 (!%p170_p3), %v1831_v0  ;;  %1794 = vmatpush1.bf16.msra.mxu1 (!%p170_p3), %v1831_v0  ;;  %v1837_v9 = vld [vmem:[%s2564_s1 + $0x30] sm:$0xff] (!%p170_p3)   ;;  %v1838_v10 = vld [vmem:[%s2564_s1 + $0x38] sm:$0xff] (!%p170_p3)   ;;  %vm887_vm2 = vcmask (!%p170_p3), 1041408   ;;  %v1963_v11 = vmov (!%p170_p3), 65535   ;;  %v1839_v13 = vld [vmem:[%s2564_s1 + $0x40] sm:$0xff] (!%p170_p3)   ;;  %vm232_vm3 = vcmask (!%p170_p3), 523264  }
   0x9   : > { %895 = vmatprep.subr.bf16.mxu0 (!%p170_p3), %v1962_v1  ;;  %1785 = vmatprep.subr.bf16.mxu1 (!%p170_p3), %v1962_v1  ;;  %v888_v12 = vsel (!%p170_p3), %vm886_vm1, 4294967295, %v1963_v11  ;;  %v1840_v14 = vld [vmem:[%s2564_s1 + $0x48] ss:$0 sps:$4 sm:$0x33] (!%p170_p3)   ;;  %v1964_v17 = vmov (!%p170_p3), 0.0  }
   0xa   : > { %v889_v15 = vsel (!%p170_p3), %vm887_vm2, %v888_v12, 0  ;;  %233 = vst.msk [vmem:[#allocation2] sm:$0xff] (!%p170_p3), %vm232_vm3, %v1964_v17  ;;  %234 = vst.msk [vmem:[#allocation2 + $0x8] sm:$0xff] (!%p170_p3), %vm232_vm3, %v1964_v17 }
   0xb   : > { %v2065_v16 = vand.u32 (!%p170_p3), %v1840_v14, %v889_v15  ;;  %235 = vst.msk [vmem:[#allocation2 + $0x10] sm:$0xff] (!%p170_p3), %vm232_vm3, %v1964_v17  ;;  %236 = vst.msk [vmem:[#allocation2 + $0x18] sm:$0xff] (!%p170_p3), %vm232_vm3, %v1964_v17 }
   0xc   : > { %896 = vmatpush1.bf16.msra.mxu0 (!%p170_p3), %v1832_v2  ;;  %1795 = vmatpush1.bf16.msra.mxu1 (!%p170_p3), %v1832_v2  ;;  %237 = vst.msk [vmem:[#allocation2 + $0x20] sm:$0xff] (!%p170_p3), %vm232_vm3, %v1964_v17  ;;  %238 = vst.msk [vmem:[#allocation2 + $0x28] sm:$0xff] (!%p170_p3), %vm232_vm3, %v1964_v17 }
   0xd   : > { %897 = vmatprep.subr.bf16.mxu0 (!%p170_p3), %v1962_v1  ;;  %1786 = vmatprep.subr.bf16.mxu1 (!%p170_p3), %v1962_v1  ;;  %239 = vst.msk [vmem:[#allocation2 + $0x30] sm:$0xff] (!%p170_p3), %vm232_vm3, %v1964_v17  ;;  %240 = vst.msk [vmem:[#allocation2 + $0x38] sm:$0xff] (!%p170_p3), %vm232_vm3, %v1964_v17 }
   0xe   : > { %s2572_s22 = smov (!%p205_p4, %s1669_s22), 255  ;;  %241 = vst.msk [vmem:[#allocation2 + $0x40] sm:$0xff] %vm232_vm3, %v1964_v17  ;;  %242 = vst.msk [vmem:[#allocation2 + $0x48] sm:$0xff] %vm232_vm3, %v1964_v17 }
   0xf   : > { %s1783_s25 = sshll.u32 %s2572_s22, 3  ;;  %243 = vst.msk [vmem:[#allocation2 + $0x50] sm:$0xff] %vm232_vm3, %v1964_v17  ;;  %244 = vst.msk [vmem:[#allocation2 + $0x58] sm:$0xff] %vm232_vm3, %v1964_v17 }
  0x10   : > { %898 = vmatpush1.bf16.msra.mxu0 %v1833_v3  ;;  %1796 = vmatpush1.bf16.msra.mxu1 %v1833_v3  ;;  %s2031_s28 = scalar_lea.vmem %s2563_s0, %s1783_s25  ;;  %245 = vst.msk [vmem:[#allocation2 + $0x60] sm:$0xff] %vm232_vm3, %v1964_v17  ;;  %246 = vst.msk [vmem:[#allocation2 + $0x68] sm:$0xff] %vm232_vm3, %v1964_v17  ;;  %s2309_s21 = scalar_lea.vmem %s2566_s3, %s1783_s25 }
  0x11   : > { %899 = vmatprep.subr.bf16.mxu0 %v1962_v1  ;;  %1787 = vmatprep.subr.bf16.mxu1 %v1962_v1  ;;  %v1843_v6 = vld [vmem:[%s2031_s28 + $0x4] ss:$8 sps:$4 sm:$0xff]   ;;  %247 = vst.msk [vmem:[#allocation2 + $0x70] sm:$0xff] %vm232_vm3, %v1964_v17  ;;  %248 = vst.msk [vmem:[#allocation2 + $0x78] sm:$0xff] %vm232_vm3, %v1964_v17  ;;  %v1841_v18 = vld [vmem:[%s2031_s28] ss:$8 sps:$4 sm:$0xff]  }
  0x12   : > { %v1846_v7 = vld [vmem:[%s2031_s28 + $0x104] ss:$8 sps:$4 sm:$0xff]   ;;  %1748 = vmatprep.mubr.msk.bf16.mxu0 %vm789_vm0, %v1843_v6  ;;  %249 = vst.msk [vmem:[#allocation2 + $0x80] sm:$0xff] %vm232_vm3, %v1964_v17  ;;  %250 = vst.msk [vmem:[#allocation2 + $0x88] sm:$0xff] %vm232_vm3, %v1964_v17  ;;  %v1844_v19 = vld [vmem:[%s2031_s28 + $0x100] ss:$8 sps:$4 sm:$0xff]  }
  0x13   : > { %1764 = vmatprep.mubr.msk.bf16.mxu1 %vm789_vm0, %v1846_v7  ;;  %251 = vst.msk [vmem:[#allocation2 + $0x90] sm:$0xff] %vm232_vm3, %v1964_v17  ;;  %252 = vst.msk [vmem:[#allocation2 + $0x98] sm:$0xff] %vm232_vm3, %v1964_v17  ;;  %v1847_v20 = vld [vmem:[%s2031_s28 + $0x14] ss:$8 sps:$4 sm:$0xff]   ;;  %v1851_v22 = vld [vmem:[%s2031_s28 + $0x10] ss:$8 sps:$4 sm:$0xff]  }
  0x14   : > { %900 = vmatpush1.bf16.msra.mxu0 %v1834_v4  ;;  %1797 = vmatpush1.bf16.msra.mxu1 %v1834_v4  ;;  %253 = vst.msk [vmem:[#allocation2 + $0xa0] sm:$0xff] %vm232_vm3, %v1964_v17  ;;  %254 = vst.msk [vmem:[#allocation2 + $0xa8] sm:$0xff] %vm232_vm3, %v1964_v17  ;;  %v1849_v21 = vld [vmem:[%s2031_s28 + $0x114] ss:$8 sps:$4 sm:$0xff]   ;;  %v1852_v23 = vld [vmem:[%s2031_s28 + $0x110] ss:$8 sps:$4 sm:$0xff]  }
  0x15   : > { %901 = vmatprep.subr.bf16.mxu0 %v1962_v1  ;;  %1788 = vmatprep.subr.bf16.mxu1 %v1962_v1  ;;  %255 = vst.msk [vmem:[#allocation2 + $0xb0] sm:$0xff] %vm232_vm3, %v1964_v17  ;;  %256 = vst.msk [vmem:[#allocation2 + $0xb8] sm:$0xff] %vm232_vm3, %v1964_v17  ;;  %v1853_v24 = vld [vmem:[%s2031_s28 + $0x24] ss:$8 sps:$4 sm:$0xff]   ;;  %v1857_v26 = vld [vmem:[%s2031_s28 + $0x20] ss:$8 sps:$4 sm:$0xff]  }
  0x16   : > { %257 = vst.msk [vmem:[#allocation2 + $0xc0] sm:$0xff] %vm232_vm3, %v1964_v17  ;;  %258 = vst.msk [vmem:[#allocation2 + $0xc8] sm:$0xff] %vm232_vm3, %v1964_v17  ;;  %v1855_v25 = vld [vmem:[%s2031_s28 + $0x124] ss:$8 sps:$4 sm:$0xff]   ;;  %v1858_v27 = vld [vmem:[%s2031_s28 + $0x120] ss:$8 sps:$4 sm:$0xff]  }
  0x17   : > { %259 = vst.msk [vmem:[#allocation2 + $0xd0] sm:$0xff] %vm232_vm3, %v1964_v17  ;;  %260 = vst.msk [vmem:[#allocation2 + $0xd8] sm:$0xff] %vm232_vm3, %v1964_v17  ;;  %v1859_v28 = vld [vmem:[%s2031_s28 + $0x34] ss:$8 sps:$4 sm:$0xff]   ;;  %v1863_v30 = vld [vmem:[%s2031_s28 + $0x30] ss:$8 sps:$4 sm:$0xff]  }
  0x18   : > { %902 = vmatpush1.bf16.msra.mxu0 %v1835_v5  ;;  %1798 = vmatpush1.bf16.msra.mxu1 %v1835_v5  ;;  %261 = vst.msk [vmem:[#allocation2 + $0xe0] sm:$0xff] %vm232_vm3, %v1964_v17  ;;  %262 = vst.msk [vmem:[#allocation2 + $0xe8] sm:$0xff] %vm232_vm3, %v1964_v17  ;;  %v1861_v29 = vld [vmem:[%s2031_s28 + $0x134] ss:$8 sps:$4 sm:$0xff]   ;;  %v1864_v31 = vld [vmem:[%s2031_s28 + $0x130] ss:$8 sps:$4 sm:$0xff]  }
  0x19   : > { %903 = vmatprep.subr.bf16.mxu0 %v1962_v1  ;;  %1789 = vmatprep.subr.bf16.mxu1 %v1962_v1  ;;  %263 = vst.msk [vmem:[#allocation2 + $0xf0] sm:$0xff] %vm232_vm3, %v1964_v17  ;;  %264 = vst.msk [vmem:[#allocation2 + $0xf8] sm:$0xff] %vm232_vm3, %v1964_v17  ;;  %v1865_v32 = vld [vmem:[%s2031_s28 + $0x44] ss:$8 sps:$4 sm:$0xff]   ;;  %v1869_v34 = vld [vmem:[%s2031_s28 + $0x40] ss:$8 sps:$4 sm:$0xff]  }
  0x1a   : > { %265 = vst.msk [vmem:[#allocation2 + $0x100] sm:$0xff] %vm232_vm3, %v1964_v17  ;;  %266 = vst.msk [vmem:[#allocation2 + $0x108] sm:$0xff] %vm232_vm3, %v1964_v17  ;;  %v1867_v33 = vld [vmem:[%s2031_s28 + $0x144] ss:$8 sps:$4 sm:$0xff]   ;;  %v1870_v35 = vld [vmem:[%s2031_s28 + $0x140] ss:$8 sps:$4 sm:$0xff]  }
  0x1b   : > { %267 = vst.msk [vmem:[#allocation2 + $0x110] sm:$0xff] %vm232_vm3, %v1964_v17  ;;  %268 = vst.msk [vmem:[#allocation2 + $0x118] sm:$0xff] %vm232_vm3, %v1964_v17  ;;  %v1871_v36 = vld [vmem:[%s2031_s28 + $0x54] ss:$8 sps:$4 sm:$0xff]   ;;  %v1875_v38 = vld [vmem:[%s2031_s28 + $0x50] ss:$8 sps:$4 sm:$0xff]  }
  0x1c   : > { %904 = vmatpush1.bf16.msra.mxu0 %v1836_v8  ;;  %1799 = vmatpush1.bf16.msra.mxu1 %v1836_v8  ;;  %269 = vst.msk [vmem:[#allocation2 + $0x120] sm:$0xff] %vm232_vm3, %v1964_v17  ;;  %270 = vst.msk [vmem:[#allocation2 + $0x128] sm:$0xff] %vm232_vm3, %v1964_v17  ;;  %v1873_v37 = vld [vmem:[%s2031_s28 + $0x154] ss:$8 sps:$4 sm:$0xff]   ;;  %v1876_v39 = vld [vmem:[%s2031_s28 + $0x150] ss:$8 sps:$4 sm:$0xff]  }
  0x1d   : > { %905 = vmatprep.subr.bf16.mxu0 %v1962_v1  ;;  %1790 = vmatprep.subr.bf16.mxu1 %v1962_v1  ;;  %271 = vst.msk [vmem:[#allocation2 + $0x130] sm:$0xff] %vm232_vm3, %v1964_v17  ;;  %272 = vst.msk [vmem:[#allocation2 + $0x138] sm:$0xff] %vm232_vm3, %v1964_v17  ;;  %v1877_v40 = vld [vmem:[%s2031_s28 + $0x64] ss:$8 sps:$4 sm:$0xff]   ;;  %v1881_v42 = vld [vmem:[%s2031_s28 + $0x60] ss:$8 sps:$4 sm:$0xff]  }
  0x1e   : > { %273 = vst.msk [vmem:[#allocation2 + $0x140] sm:$0xff] %vm232_vm3, %v1964_v17  ;;  %274 = vst.msk [vmem:[#allocation2 + $0x148] sm:$0xff] %vm232_vm3, %v1964_v17  ;;  %v1879_v41 = vld [vmem:[%s2031_s28 + $0x164] ss:$8 sps:$4 sm:$0xff]   ;;  %v1882_v43 = vld [vmem:[%s2031_s28 + $0x160] ss:$8 sps:$4 sm:$0xff]  }
  0x1f   : > { %275 = vst.msk [vmem:[#allocation2 + $0x150] sm:$0xff] %vm232_vm3, %v1964_v17  ;;  %276 = vst.msk [vmem:[#allocation2 + $0x158] sm:$0xff] %vm232_vm3, %v1964_v17  ;;  %v1883_v44 = vld [vmem:[%s2031_s28 + $0x74] ss:$8 sps:$4 sm:$0xff]   ;;  %v1887_v46 = vld [vmem:[%s2031_s28 + $0x70] ss:$8 sps:$4 sm:$0xff]  }
  0x20   : > { %906 = vmatpush1.bf16.msra.mxu0 %v1837_v9  ;;  %1800 = vmatpush1.bf16.msra.mxu1 %v1837_v9  ;;  %277 = vst.msk [vmem:[#allocation2 + $0x160] sm:$0xff] %vm232_vm3, %v1964_v17  ;;  %278 = vst.msk [vmem:[#allocation2 + $0x168] sm:$0xff] %vm232_vm3, %v1964_v17  ;;  %v1885_v45 = vld [vmem:[%s2031_s28 + $0x174] ss:$8 sps:$4 sm:$0xff]   ;;  %v1888_v47 = vld [vmem:[%s2031_s28 + $0x170] ss:$8 sps:$4 sm:$0xff]  }
  0x21   : > { %907 = vmatprep.subr.bf16.mxu0 %v1962_v1  ;;  %1791 = vmatprep.subr.bf16.mxu1 %v1962_v1  ;;  %279 = vst.msk [vmem:[#allocation2 + $0x170] sm:$0xff] %vm232_vm3, %v1964_v17  ;;  %280 = vst.msk [vmem:[#allocation2 + $0x178] sm:$0xff] %vm232_vm3, %v1964_v17  ;;  %v1889_v48 = vld [vmem:[%s2031_s28 + $0x84] ss:$8 sps:$4 sm:$0xff]   ;;  %v1893_v50 = vld [vmem:[%s2031_s28 + $0x80] ss:$8 sps:$4 sm:$0xff]  }
  0x22   : > { %281 = vst.msk [vmem:[#allocation2 + $0x180] sm:$0xff] %vm232_vm3, %v1964_v17  ;;  %282 = vst.msk [vmem:[#allocation2 + $0x188] sm:$0xff] %vm232_vm3, %v1964_v17  ;;  %v1891_v49 = vld [vmem:[%s2031_s28 + $0x184] ss:$8 sps:$4 sm:$0xff]   ;;  %v1894_v51 = vld [vmem:[%s2031_s28 + $0x180] ss:$8 sps:$4 sm:$0xff]  }
  0x23   : > { %283 = vst.msk [vmem:[#allocation2 + $0x190] sm:$0xff] %vm232_vm3, %v1964_v17  ;;  %284 = vst.msk [vmem:[#allocation2 + $0x198] sm:$0xff] %vm232_vm3, %v1964_v17  ;;  %v1895_v52 = vld [vmem:[%s2031_s28 + $0x94] ss:$8 sps:$4 sm:$0xff]   ;;  %v1899_v54 = vld [vmem:[%s2031_s28 + $0x90] ss:$8 sps:$4 sm:$0xff]  }
  0x24   : > { %908 = vmatpush1.bf16.msra.mxu0 %v1838_v10  ;;  %1801 = vmatpush1.bf16.msra.mxu1 %v1838_v10  ;;  %285 = vst.msk [vmem:[#allocation2 + $0x1a0] sm:$0xff] %vm232_vm3, %v1964_v17  ;;  %286 = vst.msk [vmem:[#allocation2 + $0x1a8] sm:$0xff] %vm232_vm3, %v1964_v17  ;;  %v1897_v53 = vld [vmem:[%s2031_s28 + $0x194] ss:$8 sps:$4 sm:$0xff]   ;;  %v1900_v55 = vld [vmem:[%s2031_s28 + $0x190] ss:$8 sps:$4 sm:$0xff]  }
  0x25   : > { %909 = vmatprep.subr.bf16.mxu0 %v1962_v1  ;;  %1792 = vmatprep.subr.bf16.mxu1 %v1962_v1  ;;  %287 = vst.msk [vmem:[#allocation2 + $0x1b0] sm:$0xff] %vm232_vm3, %v1964_v17  ;;  %288 = vst.msk [vmem:[#allocation2 + $0x1b8] sm:$0xff] %vm232_vm3, %v1964_v17  ;;  %v1901_v56 = vld [vmem:[%s2031_s28 + $0xa4] ss:$8 sps:$4 sm:$0xff]   ;;  %v1905_v58 = vld [vmem:[%s2031_s28 + $0xa0] ss:$8 sps:$4 sm:$0xff]  }
  0x26   : > { %289 = vst.msk [vmem:[#allocation2 + $0x1c0] sm:$0xff] %vm232_vm3, %v1964_v17  ;;  %290 = vst.msk [vmem:[#allocation2 + $0x1c8] sm:$0xff] %vm232_vm3, %v1964_v17  ;;  %v1903_v57 = vld [vmem:[%s2031_s28 + $0x1a4] ss:$8 sps:$4 sm:$0xff]   ;;  %v1906_v59 = vld [vmem:[%s2031_s28 + $0x1a0] ss:$8 sps:$4 sm:$0xff]  }
  0x27   : > { %291 = vst.msk [vmem:[#allocation2 + $0x1d0] sm:$0xff] %vm232_vm3, %v1964_v17  ;;  %292 = vst.msk [vmem:[#allocation2 + $0x1d8] sm:$0xff] %vm232_vm3, %v1964_v17  ;;  %v1907_v60 = vld [vmem:[%s2031_s28 + $0xb4] ss:$8 sps:$4 sm:$0xff]   ;;  %v1911_v62 = vld [vmem:[%s2031_s28 + $0xb0] ss:$8 sps:$4 sm:$0xff]  }
  0x28   : > { %910 = vmatpush1.bf16.msra.mxu0 %v1839_v13  ;;  %1802 = vmatpush1.bf16.msra.mxu1 %v1839_v13  ;;  %293 = vst.msk [vmem:[#allocation2 + $0x1e0] sm:$0xff] %vm232_vm3, %v1964_v17  ;;  %294 = vst.msk [vmem:[#allocation2 + $0x1e8] sm:$0xff] %vm232_vm3, %v1964_v17  ;;  %v1909_v61 = vld [vmem:[%s2031_s28 + $0x1b4] ss:$8 sps:$4 sm:$0xff]   ;;  %v1912_v63 = vld [vmem:[%s2031_s28 + $0x1b0] ss:$8 sps:$4 sm:$0xff]  }
  0x29   : > { %911 = vmatprep.subr.bf16.mxu0 %v1962_v1  ;;  %1793 = vmatprep.subr.bf16.mxu1 %v1962_v1  ;;  %295 = vst.msk [vmem:[#allocation2 + $0x1f0] sm:$0xff] %vm232_vm3, %v1964_v17  ;;  %296 = vst.msk [vmem:[#allocation2 + $0x1f8] sm:$0xff] %vm232_vm3, %v1964_v17  ;;  %v1913_v0 = vld [vmem:[%s2031_s28 + $0xc4] ss:$8 sps:$4 sm:$0xff]   ;;  %v1917_v2 = vld [vmem:[%s2031_s28 + $0xc0] ss:$8 sps:$4 sm:$0xff]  }
  0x2a   : > { %v1915_v1 = vld [vmem:[%s2031_s28 + $0x1c4] ss:$8 sps:$4 sm:$0xff]   ;;  %v1918_v3 = vld [vmem:[%s2031_s28 + $0x1c0] ss:$8 sps:$4 sm:$0xff]   ;;  %v1919_v4 = vld [vmem:[%s2031_s28 + $0xd4] ss:$8 sps:$4 sm:$0xff]  }
  0x2b   : > { %v1921_v5 = vld [vmem:[%s2031_s28 + $0x1d4] ss:$8 sps:$4 sm:$0xff]   ;;  %v1923_v6 = vld [vmem:[%s2031_s28 + $0xd0] ss:$8 sps:$4 sm:$0xff]   ;;  %v1925_v8 = vld [vmem:[%s2031_s28 + $0xe4] ss:$8 sps:$4 sm:$0xff]  }
  0x2c   : > { %912 = vmatpush1.bf16.msra.mxu0 %v2065_v16  ;;  %1803 = vmatpush1.bf16.msra.mxu1 %v2065_v16  ;;  %v1924_v7 = vld [vmem:[%s2031_s28 + $0x1d0] ss:$8 sps:$4 sm:$0xff]   ;;  %v1927_v9 = vld [vmem:[%s2031_s28 + $0x1e4] ss:$8 sps:$4 sm:$0xff]   ;;  %v1929_v10 = vld [vmem:[%s2031_s28 + $0xe0] ss:$8 sps:$4 sm:$0xff]  }
  0x2d   : > { %v1930_v11 = vld [vmem:[%s2031_s28 + $0x1e0] ss:$8 sps:$4 sm:$0xff]   ;;  %v1931_v12 = vld [vmem:[%s2031_s28 + $0xf4] ss:$8 sps:$4 sm:$0xff]   ;;  %v1935_v14 = vld [vmem:[%s2031_s28 + $0xf0] ss:$8 sps:$4 sm:$0xff]  }
  0x2e   : > { %v1933_v13 = vld [vmem:[%s2031_s28 + $0x1f4] ss:$8 sps:$4 sm:$0xff]   ;;  %v1936_v15 = vld [vmem:[%s2031_s28 + $0x1f0] ss:$8 sps:$4 sm:$0xff]   ;;  %v297_v16 = vld [vmem:[#allocation2] sm:$0xff] }
  0x2f   : > { %926 = vmatmul.mubr.bf16.vlgmr.msra.gmra.mrb[0].mxu0 %v1841_v18  ;;  %1054 = vmatmul.mubr.bf16.vlgmr.msra.gmra.mrb[0].mxu1 %v1844_v19  ;;  %v329_v17 = vld [vmem:[#allocation2 + $0x100] sm:$0xff] }
  0x30   : > { %1749 = vmatprep.mubr.msk.bf16.mxu0 %vm789_vm0, %v1847_v20  ;;  %1765 = vmatprep.mubr.msk.bf16.mxu1 %vm789_vm0, %v1849_v21  ;;  %v298_v20 = vld [vmem:[#allocation2 + $0x8] sm:$0xff] }
  0x31   : > { %v330_v21 = vld [vmem:[#allocation2 + $0x108] sm:$0xff] }
  0x37   : > { %934 = vmatmul.mubr.bf16.gmra.mrb[4].mxu0 %v1851_v22  ;;  %1062 = vmatmul.mubr.bf16.gmra.mrb[4].mxu1 %v1852_v23 }
  0x38   : > { %1750 = vmatprep.mubr.msk.bf16.mxu0 %vm789_vm0, %v1853_v24  ;;  %1766 = vmatprep.mubr.msk.bf16.mxu1 %vm789_vm0, %v1855_v25 }
  0x3f   : > { %942 = vmatmul.mubr.bf16.gmra.mrb[8].mxu0 %v1857_v26  ;;  %1070 = vmatmul.mubr.bf16.gmra.mrb[8].mxu1 %v1858_v27 }
  0x40   : > { %1751 = vmatprep.mubr.msk.bf16.mxu0 %vm789_vm0, %v1859_v28  ;;  %1767 = vmatprep.mubr.msk.bf16.mxu1 %vm789_vm0, %v1861_v29 }
  0x47   : > { %950 = vmatmul.mubr.bf16.gmra.mrb[12].mxu0 %v1863_v30  ;;  %1078 = vmatmul.mubr.bf16.gmra.mrb[12].mxu1 %v1864_v31 }
  0x48   : > { %1752 = vmatprep.mubr.msk.bf16.mxu0 %vm789_vm0, %v1865_v32  ;;  %1768 = vmatprep.mubr.msk.bf16.mxu1 %vm789_vm0, %v1867_v33  ;;  %v299_v32 = vld [vmem:[#allocation2 + $0x10] sm:$0xff] }
  0x49   : > { %v331_v33 = vld [vmem:[#allocation2 + $0x110] sm:$0xff] }
  0x4f   : > { %958 = vmatmul.mubr.bf16.gmra.mrb[16].mxu0 %v1869_v34  ;;  %1086 = vmatmul.mubr.bf16.gmra.mrb[16].mxu1 %v1870_v35  ;;  %v2298_v34 = vld [vmem:[%s2565_s2] ss:$0 sm:$0xff] }
  0x50   : > { %1753 = vmatprep.mubr.msk.bf16.mxu0 %vm789_vm0, %v1871_v36  ;;  %1769 = vmatprep.mubr.msk.bf16.mxu1 %vm789_vm0, %v1873_v37  ;;  %v300_v37 = vld [vmem:[#allocation2 + $0x18] sm:$0xff] }
  0x57   : > { %966 = vmatmul.mubr.bf16.gmra.mrb[20].mxu0 %v1875_v38  ;;  %1094 = vmatmul.mubr.bf16.gmra.mrb[20].mxu1 %v1876_v39  ;;  %v332_v38 = vld [vmem:[#allocation2 + $0x118] sm:$0xff] }
  0x58   : > { %1754 = vmatprep.mubr.msk.bf16.mxu0 %vm789_vm0, %v1877_v40  ;;  %1770 = vmatprep.mubr.msk.bf16.mxu1 %vm789_vm0, %v1879_v41 }
  0x5f   : > { %974 = vmatmul.mubr.bf16.gmra.mrb[24].mxu0 %v1881_v42  ;;  %1102 = vmatmul.mubr.bf16.gmra.mrb[24].mxu1 %v1882_v43 }
  0x60   : > { %1755 = vmatprep.mubr.msk.bf16.mxu0 %vm789_vm0, %v1883_v44  ;;  %1771 = vmatprep.mubr.msk.bf16.mxu1 %vm789_vm0, %v1885_v45 }
  0x67   : > { %982 = vmatmul.mubr.bf16.gmra.mrb[28].mxu0 %v1887_v46  ;;  %1110 = vmatmul.mubr.bf16.gmra.mrb[28].mxu1 %v1888_v47 }
  0x68   : > { %1756 = vmatprep.mubr.msk.bf16.mxu0 %vm789_vm0, %v1889_v48  ;;  %1772 = vmatprep.mubr.msk.bf16.mxu1 %vm789_vm0, %v1891_v49 }
  0x6f   : > { %990 = vmatmul.mubr.bf16.gmra.mrb[32].mxu0 %v1893_v50  ;;  %1118 = vmatmul.mubr.bf16.gmra.mrb[32].mxu1 %v1894_v51 }
  0x70   : > { %1757 = vmatprep.mubr.msk.bf16.mxu0 %vm789_vm0, %v1895_v52  ;;  %1773 = vmatprep.mubr.msk.bf16.mxu1 %vm789_vm0, %v1897_v53 }
  0x77   : > { %998 = vmatmul.mubr.bf16.gmra.mrb[36].mxu0 %v1899_v54  ;;  %1126 = vmatmul.mubr.bf16.gmra.mrb[36].mxu1 %v1900_v55 }
  0x78   : > { %1758 = vmatprep.mubr.msk.bf16.mxu0 %vm789_vm0, %v1901_v56  ;;  %1774 = vmatprep.mubr.msk.bf16.mxu1 %vm789_vm0, %v1903_v57 }
  0x7f   : > { %1006 = vmatmul.mubr.bf16.gmra.mrb[40].mxu0 %v1905_v58  ;;  %1134 = vmatmul.mubr.bf16.gmra.mrb[40].mxu1 %v1906_v59  ;;  %v301_v59 = vld [vmem:[#allocation2 + $0x20] sm:$0xff] }
  0x80   : > { %1759 = vmatprep.mubr.msk.bf16.mxu0 %vm789_vm0, %v1907_v60  ;;  %1775 = vmatprep.mubr.msk.bf16.mxu1 %vm789_vm0, %v1909_v61  ;;  %v333_v60 = vld [vmem:[#allocation2 + $0x120] sm:$0xff] }
  0x87   : > { %1014 = vmatmul.mubr.bf16.gmra.mrb[44].mxu0 %v1911_v62  ;;  %1142 = vmatmul.mubr.bf16.gmra.mrb[44].mxu1 %v1912_v63 }
  0x88   : > { %1760 = vmatprep.mubr.msk.bf16.mxu0 %vm789_vm0, %v1913_v0  ;;  %1776 = vmatprep.mubr.msk.bf16.mxu1 %vm789_vm0, %v1915_v1  ;;  %v302_v1 = vld [vmem:[#allocation2 + $0x28] sm:$0xff] }
  0x8f   : > { %1022 = vmatmul.mubr.bf16.gmra.mrb[48].mxu0 %v1917_v2  ;;  %1150 = vmatmul.mubr.bf16.gmra.mrb[48].mxu1 %v1918_v3  ;;  %v334_v2 = vld [vmem:[#allocation2 + $0x128] sm:$0xff] }
  0x90   : > { %1761 = vmatprep.mubr.msk.bf16.mxu0 %vm789_vm0, %v1919_v4  ;;  %1777 = vmatprep.mubr.msk.bf16.mxu1 %vm789_vm0, %v1921_v5 }
  0x97   : > { %1030 = vmatmul.mubr.bf16.gmra.mrb[52].mxu0 %v1923_v6  ;;  %1158 = vmatmul.mubr.bf16.gmra.mrb[52].mxu1 %v1924_v7 }
  0x98   : > { %1762 = vmatprep.mubr.msk.bf16.mxu0 %vm789_vm0, %v1925_v8  ;;  %1778 = vmatprep.mubr.msk.bf16.mxu1 %vm789_vm0, %v1927_v9 }
  0x9f   : > { %1038 = vmatmul.mubr.bf16.gmra.mrb[56].mxu0 %v1929_v10  ;;  %1166 = vmatmul.mubr.bf16.gmra.mrb[56].mxu1 %v1930_v11 }
  0xa0   : > { %1763 = vmatprep.mubr.msk.bf16.mxu0 %vm789_vm0, %v1931_v12  ;;  %1779 = vmatprep.mubr.msk.bf16.mxu1 %vm789_vm0, %v1933_v13 }
  0xa7   : > { %1046 = vmatmul.mubr.bf16.gmra.mrb[60].mxu0 %v1935_v14  ;;  %1174 = vmatmul.mubr.bf16.gmra.mrb[60].mxu1 %v1936_v15 }
 0x102   : > { %v927_v18 = vpop.f32.mrb[0].mxu0  ;;  %v1055_v19 = vpop.f32.mrb[0].mxu1 }
 0x103   : > { %v1182_v22 = vadd.f32 %v927_v18, %v297_v16  ;;  %v1214_v23 = vadd.f32 %v1055_v19, %v329_v17  ;;  %v929_v24 = vpop.f32.mrb[1].mxu0  ;;  %v1057_v25 = vpop.f32.mrb[1].mxu1 }
 0x104   : > { %v930_v26 = vpop.f32.mrb[2].mxu0  ;;  %v1058_v27 = vpop.f32.mrb[2].mxu1  ;;  %v335_v24 = vld [vmem:[#allocation2 + $0x130] sm:$0xff] }
 0x105   : > { %1247 = vst.msk [vmem:[#allocation2] sm:$0xff] %vm232_vm3, %v1182_v22  ;;  %1279 = vst.msk [vmem:[#allocation2 + $0x100] sm:$0xff] %vm232_vm3, %v1214_v23  ;;  %v1183_v28 = vadd.f32 %v930_v26, %v298_v20  ;;  %v1215_v29 = vadd.f32 %v1058_v27, %v330_v21  ;;  %v932_v30 = vpop.f32.mrb[3].mxu0  ;;  %v1060_v31 = vpop.f32.mrb[3].mxu1  ;;  %v303_v23 = vld [vmem:[#allocation2 + $0x30] sm:$0xff] }
 0x106   : > { %v336_v30 = vld [vmem:[#allocation2 + $0x138] sm:$0xff] }
 0x107   : > { %1248 = vst.msk [vmem:[#allocation2 + $0x8] sm:$0xff] %vm232_vm3, %v1183_v28  ;;  %1280 = vst.msk [vmem:[#allocation2 + $0x108] sm:$0xff] %vm232_vm3, %v1215_v29  ;;  %v304_v29 = vld [vmem:[#allocation2 + $0x38] sm:$0xff] }
 0x10a   : > { %v935_v35 = vpop.f32.mrb[4].mxu0  ;;  %v1063_v36 = vpop.f32.mrb[4].mxu1 }
 0x10b   : > { %v1184_v39 = vadd.f32 %v935_v35, %v299_v32  ;;  %v1216_v40 = vadd.f32 %v1063_v36, %v331_v33  ;;  %v937_v41 = vpop.f32.mrb[5].mxu0  ;;  %v1065_v42 = vpop.f32.mrb[5].mxu1 }
 0x10c   : > { %v1314_v43 = vld [vmem:[#allocation2] sm:$0xff]  ;;  %v938_v45 = vpop.f32.mrb[6].mxu0  ;;  %v1066_v46 = vpop.f32.mrb[6].mxu1 }
 0x10d   : > { %v1346_v44 = vld [vmem:[#allocation2 + $0x100] sm:$0xff]  ;;  %v1385_v47 = vadd.f32 %v2298_v34, %v1314_v43  ;;  %1249 = vst.msk [vmem:[#allocation2 + $0x10] sm:$0xff] %vm232_vm3, %v1184_v39  ;;  %1281 = vst.msk [vmem:[#allocation2 + $0x110] sm:$0xff] %vm232_vm3, %v1216_v40  ;;  %v1185_v49 = vadd.f32 %v938_v45, %v300_v37  ;;  %v1217_v50 = vadd.f32 %v1066_v46, %v332_v38  ;;  %v940_v51 = vpop.f32.mrb[7].mxu0  ;;  %v1068_v52 = vpop.f32.mrb[7].mxu1 }
 0x10e   : > { %v1417_v48 = vadd.f32 %v2298_v34, %v1346_v44  ;;  %v1315_v53 = vld [vmem:[#allocation2 + $0x8] sm:$0xff]  ;;  %v305_v52 = vld [vmem:[#allocation2 + $0x40] sm:$0xff] }
 0x10f   : > { %v1347_v54 = vld [vmem:[#allocation2 + $0x108] sm:$0xff]  ;;  %v1449_v55 = vmax.f32 %v1385_v47, 0.0  ;;  %v1386_v57 = vadd.f32 %v2298_v34, %v1315_v53  ;;  %1250 = vst.msk [vmem:[#allocation2 + $0x18] sm:$0xff] %vm232_vm3, %v1185_v49  ;;  %1282 = vst.msk [vmem:[#allocation2 + $0x118] sm:$0xff] %vm232_vm3, %v1217_v50  ;;  %v337_v53 = vld [vmem:[#allocation2 + $0x140] sm:$0xff] }
 0x110   : > { %v1481_v56 = vmax.f32 %v1417_v48, 0.0  ;;  %v1418_v58 = vadd.f32 %v2298_v34, %v1347_v54 }
 0x111   : > { %1513 = vst.msk [vmem:[%s2309_s21] sm:$0xff] %vm232_vm3, %v1449_v55  ;;  %v1450_v61 = vmax.f32 %v1386_v57, 0.0 }
 0x112   : > { %1545 = vst.msk [vmem:[%s2309_s21 + $0x100] sm:$0xff] %vm232_vm3, %v1481_v56  ;;  %v1482_v62 = vmax.f32 %v1418_v58, 0.0  ;;  %v943_v63 = vpop.f32.mrb[8].mxu0  ;;  %v1071_v0 = vpop.f32.mrb[8].mxu1  ;;  %v306_v58 = vld [vmem:[#allocation2 + $0x48] sm:$0xff] }
 0x113   : > { %1514 = vst.msk [vmem:[%s2309_s21 + $0x8] sm:$0xff] %vm232_vm3, %v1450_v61  ;;  %v1186_v3 = vadd.f32 %v943_v63, %v301_v59  ;;  %v1218_v4 = vadd.f32 %v1071_v0, %v333_v60  ;;  %v945_v5 = vpop.f32.mrb[9].mxu0  ;;  %v1073_v6 = vpop.f32.mrb[9].mxu1  ;;  %v338_v59 = vld [vmem:[#allocation2 + $0x148] sm:$0xff] }
 0x114   : > { %1546 = vst.msk [vmem:[%s2309_s21 + $0x108] sm:$0xff] %vm232_vm3, %v1482_v62  ;;  %v1316_v7 = vld [vmem:[#allocation2 + $0x10] sm:$0xff]  ;;  %v946_v9 = vpop.f32.mrb[10].mxu0  ;;  %v1074_v10 = vpop.f32.mrb[10].mxu1 }
 0x115   : > { %v1348_v8 = vld [vmem:[#allocation2 + $0x110] sm:$0xff]  ;;  %v1387_v11 = vadd.f32 %v2298_v34, %v1316_v7  ;;  %1251 = vst.msk [vmem:[#allocation2 + $0x20] sm:$0xff] %vm232_vm3, %v1186_v3  ;;  %1283 = vst.msk [vmem:[#allocation2 + $0x120] sm:$0xff] %vm232_vm3, %v1218_v4  ;;  %v1187_v13 = vadd.f32 %v946_v9, %v302_v1  ;;  %v1219_v14 = vadd.f32 %v1074_v10, %v334_v2  ;;  %v948_v15 = vpop.f32.mrb[11].mxu0  ;;  %v1076_v16 = vpop.f32.mrb[11].mxu1 }
 0x116   : > { %v1419_v12 = vadd.f32 %v2298_v34, %v1348_v8  ;;  %v1317_v17 = vld [vmem:[#allocation2 + $0x18] sm:$0xff]  ;;  %v307_v16 = vld [vmem:[#allocation2 + $0x50] sm:$0xff] }
 0x117   : > { %v1349_v18 = vld [vmem:[#allocation2 + $0x118] sm:$0xff]  ;;  %v1451_v19 = vmax.f32 %v1387_v11, 0.0  ;;  %v1388_v21 = vadd.f32 %v2298_v34, %v1317_v17  ;;  %1252 = vst.msk [vmem:[#allocation2 + $0x28] sm:$0xff] %vm232_vm3, %v1187_v13  ;;  %1284 = vst.msk [vmem:[#allocation2 + $0x128] sm:$0xff] %vm232_vm3, %v1219_v14  ;;  %v339_v17 = vld [vmem:[#allocation2 + $0x150] sm:$0xff] }
 0x118   : > { %v1483_v20 = vmax.f32 %v1419_v12, 0.0  ;;  %v1420_v22 = vadd.f32 %v2298_v34, %v1349_v18 }
 0x119   : > { %1515 = vst.msk [vmem:[%s2309_s21 + $0x10] sm:$0xff] %vm232_vm3, %v1451_v19  ;;  %v1452_v25 = vmax.f32 %v1388_v21, 0.0 }
 0x11a   : > { %1547 = vst.msk [vmem:[%s2309_s21 + $0x110] sm:$0xff] %vm232_vm3, %v1483_v20  ;;  %v1484_v26 = vmax.f32 %v1420_v22, 0.0  ;;  %v951_v27 = vpop.f32.mrb[12].mxu0  ;;  %v1079_v28 = vpop.f32.mrb[12].mxu1  ;;  %v308_v22 = vld [vmem:[#allocation2 + $0x58] sm:$0xff] }
 0x11b   : > { %1516 = vst.msk [vmem:[%s2309_s21 + $0x18] sm:$0xff] %vm232_vm3, %v1452_v25  ;;  %v1188_v31 = vadd.f32 %v951_v27, %v303_v23  ;;  %v1220_v32 = vadd.f32 %v1079_v28, %v335_v24  ;;  %v953_v33 = vpop.f32.mrb[13].mxu0  ;;  %v1081_v35 = vpop.f32.mrb[13].mxu1  ;;  %v340_v23 = vld [vmem:[#allocation2 + $0x158] sm:$0xff] }
 0x11c   : > { %1548 = vst.msk [vmem:[%s2309_s21 + $0x118] sm:$0xff] %vm232_vm3, %v1484_v26  ;;  %v1318_v36 = vld [vmem:[#allocation2 + $0x20] sm:$0xff]  ;;  %v954_v38 = vpop.f32.mrb[14].mxu0  ;;  %v1082_v39 = vpop.f32.mrb[14].mxu1 }
 0x11d   : > { %v1350_v37 = vld [vmem:[#allocation2 + $0x120] sm:$0xff]  ;;  %v1389_v40 = vadd.f32 %v2298_v34, %v1318_v36  ;;  %1253 = vst.msk [vmem:[#allocation2 + $0x30] sm:$0xff] %vm232_vm3, %v1188_v31  ;;  %1285 = vst.msk [vmem:[#allocation2 + $0x130] sm:$0xff] %vm232_vm3, %v1220_v32  ;;  %v1189_v42 = vadd.f32 %v954_v38, %v304_v29  ;;  %v1221_v43 = vadd.f32 %v1082_v39, %v336_v30  ;;  %v956_v44 = vpop.f32.mrb[15].mxu0  ;;  %v1084_v45 = vpop.f32.mrb[15].mxu1 }
 0x11e   : > { %v1421_v41 = vadd.f32 %v2298_v34, %v1350_v37  ;;  %v1319_v46 = vld [vmem:[#allocation2 + $0x28] sm:$0xff]  ;;  %v309_v45 = vld [vmem:[#allocation2 + $0x60] sm:$0xff] }
 0x11f   : > { %v1351_v47 = vld [vmem:[#allocation2 + $0x128] sm:$0xff]  ;;  %v1453_v48 = vmax.f32 %v1389_v40, 0.0  ;;  %v1390_v50 = vadd.f32 %v2298_v34, %v1319_v46  ;;  %1254 = vst.msk [vmem:[#allocation2 + $0x38] sm:$0xff] %vm232_vm3, %v1189_v42  ;;  %1286 = vst.msk [vmem:[#allocation2 + $0x138] sm:$0xff] %vm232_vm3, %v1221_v43  ;;  %v341_v46 = vld [vmem:[#allocation2 + $0x160] sm:$0xff] }
 0x120   : > { %v1485_v49 = vmax.f32 %v1421_v41, 0.0  ;;  %v1422_v51 = vadd.f32 %v2298_v34, %v1351_v47 }
 0x121   : > { %1517 = vst.msk [vmem:[%s2309_s21 + $0x20] sm:$0xff] %vm232_vm3, %v1453_v48  ;;  %v1454_v54 = vmax.f32 %v1390_v50, 0.0 }
 0x122   : > { %1549 = vst.msk [vmem:[%s2309_s21 + $0x120] sm:$0xff] %vm232_vm3, %v1485_v49  ;;  %v1486_v55 = vmax.f32 %v1422_v51, 0.0  ;;  %v959_v56 = vpop.f32.mrb[16].mxu0  ;;  %v1087_v57 = vpop.f32.mrb[16].mxu1  ;;  %v310_v51 = vld [vmem:[#allocation2 + $0x68] sm:$0xff] }
 0x123   : > { %1518 = vst.msk [vmem:[%s2309_s21 + $0x28] sm:$0xff] %vm232_vm3, %v1454_v54  ;;  %v1190_v60 = vadd.f32 %v959_v56, %v305_v52  ;;  %v1222_v61 = vadd.f32 %v1087_v57, %v337_v53  ;;  %v961_v62 = vpop.f32.mrb[17].mxu0  ;;  %v1089_v63 = vpop.f32.mrb[17].mxu1  ;;  %v342_v52 = vld [vmem:[#allocation2 + $0x168] sm:$0xff] }
 0x124   : > { %1550 = vst.msk [vmem:[%s2309_s21 + $0x128] sm:$0xff] %vm232_vm3, %v1486_v55  ;;  %v1320_v0 = vld [vmem:[#allocation2 + $0x30] sm:$0xff]  ;;  %v962_v2 = vpop.f32.mrb[18].mxu0  ;;  %v1090_v3 = vpop.f32.mrb[18].mxu1 }
 0x125   : > { %v1352_v1 = vld [vmem:[#allocation2 + $0x130] sm:$0xff]  ;;  %v1391_v4 = vadd.f32 %v2298_v34, %v1320_v0  ;;  %1255 = vst.msk [vmem:[#allocation2 + $0x40] sm:$0xff] %vm232_vm3, %v1190_v60  ;;  %1287 = vst.msk [vmem:[#allocation2 + $0x140] sm:$0xff] %vm232_vm3, %v1222_v61  ;;  %v1191_v6 = vadd.f32 %v962_v2, %v306_v58  ;;  %v1223_v7 = vadd.f32 %v1090_v3, %v338_v59  ;;  %v964_v8 = vpop.f32.mrb[19].mxu0  ;;  %v1092_v9 = vpop.f32.mrb[19].mxu1 }
 0x126   : > { %v1423_v5 = vadd.f32 %v2298_v34, %v1352_v1  ;;  %v1321_v10 = vld [vmem:[#allocation2 + $0x38] sm:$0xff]  ;;  %v311_v9 = vld [vmem:[#allocation2 + $0x70] sm:$0xff] }
 0x127   : > { %v1353_v11 = vld [vmem:[#allocation2 + $0x138] sm:$0xff]  ;;  %v1455_v12 = vmax.f32 %v1391_v4, 0.0  ;;  %v1392_v14 = vadd.f32 %v2298_v34, %v1321_v10  ;;  %1256 = vst.msk [vmem:[#allocation2 + $0x48] sm:$0xff] %vm232_vm3, %v1191_v6  ;;  %1288 = vst.msk [vmem:[#allocation2 + $0x148] sm:$0xff] %vm232_vm3, %v1223_v7  ;;  %v343_v10 = vld [vmem:[#allocation2 + $0x170] sm:$0xff] }
 0x128   : > { %v1487_v13 = vmax.f32 %v1423_v5, 0.0  ;;  %v1424_v15 = vadd.f32 %v2298_v34, %v1353_v11 }
 0x129   : > { %1519 = vst.msk [vmem:[%s2309_s21 + $0x30] sm:$0xff] %vm232_vm3, %v1455_v12  ;;  %v1456_v18 = vmax.f32 %v1392_v14, 0.0 }
 0x12a   : > { %1551 = vst.msk [vmem:[%s2309_s21 + $0x130] sm:$0xff] %vm232_vm3, %v1487_v13  ;;  %v1488_v19 = vmax.f32 %v1424_v15, 0.0  ;;  %v967_v20 = vpop.f32.mrb[20].mxu0  ;;  %v1095_v21 = vpop.f32.mrb[20].mxu1  ;;  %v312_v15 = vld [vmem:[#allocation2 + $0x78] sm:$0xff] }
 0x12b   : > { %1520 = vst.msk [vmem:[%s2309_s21 + $0x38] sm:$0xff] %vm232_vm3, %v1456_v18  ;;  %v1192_v24 = vadd.f32 %v967_v20, %v307_v16  ;;  %v1224_v25 = vadd.f32 %v1095_v21, %v339_v17  ;;  %v969_v26 = vpop.f32.mrb[21].mxu0  ;;  %v1097_v27 = vpop.f32.mrb[21].mxu1  ;;  %v344_v16 = vld [vmem:[#allocation2 + $0x178] sm:$0xff] }
 0x12c   : > { %1552 = vst.msk [vmem:[%s2309_s21 + $0x138] sm:$0xff] %vm232_vm3, %v1488_v19  ;;  %v1322_v28 = vld [vmem:[#allocation2 + $0x40] sm:$0xff]  ;;  %v970_v30 = vpop.f32.mrb[22].mxu0  ;;  %v1098_v31 = vpop.f32.mrb[22].mxu1 }
 0x12d   : > { %v1354_v29 = vld [vmem:[#allocation2 + $0x140] sm:$0xff]  ;;  %v1393_v32 = vadd.f32 %v2298_v34, %v1322_v28  ;;  %1257 = vst.msk [vmem:[#allocation2 + $0x50] sm:$0xff] %vm232_vm3, %v1192_v24  ;;  %1289 = vst.msk [vmem:[#allocation2 + $0x150] sm:$0xff] %vm232_vm3, %v1224_v25  ;;  %v1193_v35 = vadd.f32 %v970_v30, %v308_v22  ;;  %v1225_v36 = vadd.f32 %v1098_v31, %v340_v23  ;;  %v972_v37 = vpop.f32.mrb[23].mxu0  ;;  %v1100_v38 = vpop.f32.mrb[23].mxu1 }
 0x12e   : > { %v1425_v33 = vadd.f32 %v2298_v34, %v1354_v29  ;;  %v1323_v39 = vld [vmem:[#allocation2 + $0x48] sm:$0xff]  ;;  %v313_v38 = vld [vmem:[#allocation2 + $0x80] sm:$0xff] }
 0x12f   : > { %v1355_v40 = vld [vmem:[#allocation2 + $0x148] sm:$0xff]  ;;  %v1457_v41 = vmax.f32 %v1393_v32, 0.0  ;;  %v1394_v43 = vadd.f32 %v2298_v34, %v1323_v39  ;;  %1258 = vst.msk [vmem:[#allocation2 + $0x58] sm:$0xff] %vm232_vm3, %v1193_v35  ;;  %1290 = vst.msk [vmem:[#allocation2 + $0x158] sm:$0xff] %vm232_vm3, %v1225_v36  ;;  %v345_v39 = vld [vmem:[#allocation2 + $0x180] sm:$0xff] }
 0x130   : > { %v1489_v42 = vmax.f32 %v1425_v33, 0.0  ;;  %v1426_v44 = vadd.f32 %v2298_v34, %v1355_v40 }
 0x131   : > { %1521 = vst.msk [vmem:[%s2309_s21 + $0x40] sm:$0xff] %vm232_vm3, %v1457_v41  ;;  %v1458_v47 = vmax.f32 %v1394_v43, 0.0 }
 0x132   : > { %1553 = vst.msk [vmem:[%s2309_s21 + $0x140] sm:$0xff] %vm232_vm3, %v1489_v42  ;;  %v1490_v48 = vmax.f32 %v1426_v44, 0.0  ;;  %v975_v49 = vpop.f32.mrb[24].mxu0  ;;  %v1103_v50 = vpop.f32.mrb[24].mxu1  ;;  %v314_v44 = vld [vmem:[#allocation2 + $0x88] sm:$0xff] }
 0x133   : > { %1522 = vst.msk [vmem:[%s2309_s21 + $0x48] sm:$0xff] %vm232_vm3, %v1458_v47  ;;  %v1194_v53 = vadd.f32 %v975_v49, %v309_v45  ;;  %v1226_v54 = vadd.f32 %v1103_v50, %v341_v46  ;;  %v977_v55 = vpop.f32.mrb[25].mxu0  ;;  %v1105_v56 = vpop.f32.mrb[25].mxu1  ;;  %v346_v45 = vld [vmem:[#allocation2 + $0x188] sm:$0xff] }
 0x134   : > { %1554 = vst.msk [vmem:[%s2309_s21 + $0x148] sm:$0xff] %vm232_vm3, %v1490_v48  ;;  %v1324_v57 = vld [vmem:[#allocation2 + $0x50] sm:$0xff]  ;;  %v978_v59 = vpop.f32.mrb[26].mxu0  ;;  %v1106_v60 = vpop.f32.mrb[26].mxu1 }
 0x135   : > { %v1356_v58 = vld [vmem:[#allocation2 + $0x150] sm:$0xff]  ;;  %v1395_v61 = vadd.f32 %v2298_v34, %v1324_v57  ;;  %1259 = vst.msk [vmem:[#allocation2 + $0x60] sm:$0xff] %vm232_vm3, %v1194_v53  ;;  %1291 = vst.msk [vmem:[#allocation2 + $0x160] sm:$0xff] %vm232_vm3, %v1226_v54  ;;  %v1195_v63 = vadd.f32 %v978_v59, %v310_v51  ;;  %v1227_v0 = vadd.f32 %v1106_v60, %v342_v52  ;;  %v980_v1 = vpop.f32.mrb[27].mxu0  ;;  %v1108_v2 = vpop.f32.mrb[27].mxu1 }
 0x136   : > { %v1427_v62 = vadd.f32 %v2298_v34, %v1356_v58  ;;  %v1325_v3 = vld [vmem:[#allocation2 + $0x58] sm:$0xff]  ;;  %v315_v2 = vld [vmem:[#allocation2 + $0x90] sm:$0xff] }
 0x137   : > { %v1357_v4 = vld [vmem:[#allocation2 + $0x158] sm:$0xff]  ;;  %v1459_v5 = vmax.f32 %v1395_v61, 0.0  ;;  %v1396_v7 = vadd.f32 %v2298_v34, %v1325_v3  ;;  %1260 = vst.msk [vmem:[#allocation2 + $0x68] sm:$0xff] %vm232_vm3, %v1195_v63  ;;  %1292 = vst.msk [vmem:[#allocation2 + $0x168] sm:$0xff] %vm232_vm3, %v1227_v0  ;;  %v347_v3 = vld [vmem:[#allocation2 + $0x190] sm:$0xff] }
 0x138   : > { %v1491_v6 = vmax.f32 %v1427_v62, 0.0  ;;  %v1428_v8 = vadd.f32 %v2298_v34, %v1357_v4 }
 0x139   : > { %1523 = vst.msk [vmem:[%s2309_s21 + $0x50] sm:$0xff] %vm232_vm3, %v1459_v5  ;;  %v1460_v11 = vmax.f32 %v1396_v7, 0.0 }
 0x13a   : > { %1555 = vst.msk [vmem:[%s2309_s21 + $0x150] sm:$0xff] %vm232_vm3, %v1491_v6  ;;  %v1492_v12 = vmax.f32 %v1428_v8, 0.0  ;;  %v983_v13 = vpop.f32.mrb[28].mxu0  ;;  %v1111_v14 = vpop.f32.mrb[28].mxu1  ;;  %v316_v8 = vld [vmem:[#allocation2 + $0x98] sm:$0xff] }
 0x13b   : > { %1524 = vst.msk [vmem:[%s2309_s21 + $0x58] sm:$0xff] %vm232_vm3, %v1460_v11  ;;  %v1196_v17 = vadd.f32 %v983_v13, %v311_v9  ;;  %v1228_v18 = vadd.f32 %v1111_v14, %v343_v10  ;;  %v985_v19 = vpop.f32.mrb[29].mxu0  ;;  %v1113_v20 = vpop.f32.mrb[29].mxu1  ;;  %v348_v9 = vld [vmem:[#allocation2 + $0x198] sm:$0xff] }
 0x13c   : > { %1556 = vst.msk [vmem:[%s2309_s21 + $0x158] sm:$0xff] %vm232_vm3, %v1492_v12  ;;  %v1326_v21 = vld [vmem:[#allocation2 + $0x60] sm:$0xff]  ;;  %v986_v23 = vpop.f32.mrb[30].mxu0  ;;  %v1114_v24 = vpop.f32.mrb[30].mxu1 }
 0x13d   : > { %v1358_v22 = vld [vmem:[#allocation2 + $0x160] sm:$0xff]  ;;  %v1397_v25 = vadd.f32 %v2298_v34, %v1326_v21  ;;  %1261 = vst.msk [vmem:[#allocation2 + $0x70] sm:$0xff] %vm232_vm3, %v1196_v17  ;;  %1293 = vst.msk [vmem:[#allocation2 + $0x170] sm:$0xff] %vm232_vm3, %v1228_v18  ;;  %v1197_v27 = vadd.f32 %v986_v23, %v312_v15  ;;  %v1229_v28 = vadd.f32 %v1114_v24, %v344_v16  ;;  %v988_v29 = vpop.f32.mrb[31].mxu0  ;;  %v1116_v30 = vpop.f32.mrb[31].mxu1 }
 0x13e   : > { %v1429_v26 = vadd.f32 %v2298_v34, %v1358_v22  ;;  %v1327_v31 = vld [vmem:[#allocation2 + $0x68] sm:$0xff]  ;;  %v317_v30 = vld [vmem:[#allocation2 + $0xa0] sm:$0xff] }
 0x13f   : > { %v1359_v32 = vld [vmem:[#allocation2 + $0x168] sm:$0xff]  ;;  %v1461_v33 = vmax.f32 %v1397_v25, 0.0  ;;  %v1398_v36 = vadd.f32 %v2298_v34, %v1327_v31  ;;  %1262 = vst.msk [vmem:[#allocation2 + $0x78] sm:$0xff] %vm232_vm3, %v1197_v27  ;;  %1294 = vst.msk [vmem:[#allocation2 + $0x178] sm:$0xff] %vm232_vm3, %v1229_v28  ;;  %v349_v31 = vld [vmem:[#allocation2 + $0x1a0] sm:$0xff] }
 0x140   : > { %v1493_v35 = vmax.f32 %v1429_v26, 0.0  ;;  %v1430_v37 = vadd.f32 %v2298_v34, %v1359_v32 }
 0x141   : > { %1525 = vst.msk [vmem:[%s2309_s21 + $0x60] sm:$0xff] %vm232_vm3, %v1461_v33  ;;  %v1462_v40 = vmax.f32 %v1398_v36, 0.0 }
 0x142   : > { %1557 = vst.msk [vmem:[%s2309_s21 + $0x160] sm:$0xff] %vm232_vm3, %v1493_v35  ;;  %v1494_v41 = vmax.f32 %v1430_v37, 0.0  ;;  %v991_v42 = vpop.f32.mrb[32].mxu0  ;;  %v1119_v43 = vpop.f32.mrb[32].mxu1  ;;  %v318_v37 = vld [vmem:[#allocation2 + $0xa8] sm:$0xff] }
 0x143   : > { %1526 = vst.msk [vmem:[%s2309_s21 + $0x68] sm:$0xff] %vm232_vm3, %v1462_v40  ;;  %v1198_v46 = vadd.f32 %v991_v42, %v313_v38  ;;  %v1230_v47 = vadd.f32 %v1119_v43, %v345_v39  ;;  %v993_v48 = vpop.f32.mrb[33].mxu0  ;;  %v1121_v49 = vpop.f32.mrb[33].mxu1  ;;  %v350_v38 = vld [vmem:[#allocation2 + $0x1a8] sm:$0xff] }
 0x144   : > { %1558 = vst.msk [vmem:[%s2309_s21 + $0x168] sm:$0xff] %vm232_vm3, %v1494_v41  ;;  %v1328_v50 = vld [vmem:[#allocation2 + $0x70] sm:$0xff]  ;;  %v994_v52 = vpop.f32.mrb[34].mxu0  ;;  %v1122_v53 = vpop.f32.mrb[34].mxu1 }
 0x145   : > { %v1360_v51 = vld [vmem:[#allocation2 + $0x170] sm:$0xff]  ;;  %v1399_v54 = vadd.f32 %v2298_v34, %v1328_v50  ;;  %1263 = vst.msk [vmem:[#allocation2 + $0x80] sm:$0xff] %vm232_vm3, %v1198_v46  ;;  %1295 = vst.msk [vmem:[#allocation2 + $0x180] sm:$0xff] %vm232_vm3, %v1230_v47  ;;  %v1199_v56 = vadd.f32 %v994_v52, %v314_v44  ;;  %v1231_v57 = vadd.f32 %v1122_v53, %v346_v45  ;;  %v996_v58 = vpop.f32.mrb[35].mxu0  ;;  %v1124_v59 = vpop.f32.mrb[35].mxu1 }
 0x146   : > { %v1431_v55 = vadd.f32 %v2298_v34, %v1360_v51  ;;  %v1329_v60 = vld [vmem:[#allocation2 + $0x78] sm:$0xff]  ;;  %v319_v59 = vld [vmem:[#allocation2 + $0xb0] sm:$0xff] }
 0x147   : > { %v1361_v61 = vld [vmem:[#allocation2 + $0x178] sm:$0xff]  ;;  %v1463_v62 = vmax.f32 %v1399_v54, 0.0  ;;  %v1400_v0 = vadd.f32 %v2298_v34, %v1329_v60  ;;  %1264 = vst.msk [vmem:[#allocation2 + $0x88] sm:$0xff] %vm232_vm3, %v1199_v56  ;;  %1296 = vst.msk [vmem:[#allocation2 + $0x188] sm:$0xff] %vm232_vm3, %v1231_v57  ;;  %v351_v60 = vld [vmem:[#allocation2 + $0x1b0] sm:$0xff] }
 0x148   : > { %v1495_v63 = vmax.f32 %v1431_v55, 0.0  ;;  %v1432_v1 = vadd.f32 %v2298_v34, %v1361_v61 }
 0x149   : > { %1527 = vst.msk [vmem:[%s2309_s21 + $0x70] sm:$0xff] %vm232_vm3, %v1463_v62  ;;  %v1464_v4 = vmax.f32 %v1400_v0, 0.0 }
 0x14a   : > { %1559 = vst.msk [vmem:[%s2309_s21 + $0x170] sm:$0xff] %vm232_vm3, %v1495_v63  ;;  %v1496_v5 = vmax.f32 %v1432_v1, 0.0  ;;  %v999_v6 = vpop.f32.mrb[36].mxu0  ;;  %v1127_v7 = vpop.f32.mrb[36].mxu1  ;;  %v320_v1 = vld [vmem:[#allocation2 + $0xb8] sm:$0xff] }
 0x14b   : > { %1528 = vst.msk [vmem:[%s2309_s21 + $0x78] sm:$0xff] %vm232_vm3, %v1464_v4  ;;  %v1200_v10 = vadd.f32 %v999_v6, %v315_v2  ;;  %v1232_v11 = vadd.f32 %v1127_v7, %v347_v3  ;;  %v1001_v12 = vpop.f32.mrb[37].mxu0  ;;  %v1129_v13 = vpop.f32.mrb[37].mxu1  ;;  %v352_v2 = vld [vmem:[#allocation2 + $0x1b8] sm:$0xff] }
 0x14c   : > { %1560 = vst.msk [vmem:[%s2309_s21 + $0x178] sm:$0xff] %vm232_vm3, %v1496_v5  ;;  %v1330_v14 = vld [vmem:[#allocation2 + $0x80] sm:$0xff]  ;;  %v1002_v16 = vpop.f32.mrb[38].mxu0  ;;  %v1130_v17 = vpop.f32.mrb[38].mxu1 }
 0x14d   : > { %v1362_v15 = vld [vmem:[#allocation2 + $0x180] sm:$0xff]  ;;  %v1401_v18 = vadd.f32 %v2298_v34, %v1330_v14  ;;  %1265 = vst.msk [vmem:[#allocation2 + $0x90] sm:$0xff] %vm232_vm3, %v1200_v10  ;;  %1297 = vst.msk [vmem:[#allocation2 + $0x190] sm:$0xff] %vm232_vm3, %v1232_v11  ;;  %v1201_v20 = vadd.f32 %v1002_v16, %v316_v8  ;;  %v1233_v21 = vadd.f32 %v1130_v17, %v348_v9  ;;  %v1004_v22 = vpop.f32.mrb[39].mxu0  ;;  %v1132_v23 = vpop.f32.mrb[39].mxu1 }
 0x14e   : > { %v1433_v19 = vadd.f32 %v2298_v34, %v1362_v15  ;;  %v1331_v24 = vld [vmem:[#allocation2 + $0x88] sm:$0xff]  ;;  %v321_v23 = vld [vmem:[#allocation2 + $0xc0] sm:$0xff] }
 0x14f   : > { %v1363_v25 = vld [vmem:[#allocation2 + $0x188] sm:$0xff]  ;;  %v1465_v26 = vmax.f32 %v1401_v18, 0.0  ;;  %v1402_v28 = vadd.f32 %v2298_v34, %v1331_v24  ;;  %1266 = vst.msk [vmem:[#allocation2 + $0x98] sm:$0xff] %vm232_vm3, %v1201_v20  ;;  %1298 = vst.msk [vmem:[#allocation2 + $0x198] sm:$0xff] %vm232_vm3, %v1233_v21  ;;  %v353_v24 = vld [vmem:[#allocation2 + $0x1c0] sm:$0xff] }
 0x150   : > { %v1497_v27 = vmax.f32 %v1433_v19, 0.0  ;;  %v1434_v29 = vadd.f32 %v2298_v34, %v1363_v25 }
 0x151   : > { %1529 = vst.msk [vmem:[%s2309_s21 + $0x80] sm:$0xff] %vm232_vm3, %v1465_v26  ;;  %v1466_v32 = vmax.f32 %v1402_v28, 0.0 }
 0x152   : > { %1561 = vst.msk [vmem:[%s2309_s21 + $0x180] sm:$0xff] %vm232_vm3, %v1497_v27  ;;  %v1498_v33 = vmax.f32 %v1434_v29, 0.0  ;;  %v1007_v35 = vpop.f32.mrb[40].mxu0  ;;  %v1135_v36 = vpop.f32.mrb[40].mxu1  ;;  %v322_v29 = vld [vmem:[#allocation2 + $0xc8] sm:$0xff] }
 0x153   : > { %1530 = vst.msk [vmem:[%s2309_s21 + $0x88] sm:$0xff] %vm232_vm3, %v1466_v32  ;;  %v1202_v39 = vadd.f32 %v1007_v35, %v317_v30  ;;  %v1234_v40 = vadd.f32 %v1135_v36, %v349_v31  ;;  %v1009_v41 = vpop.f32.mrb[41].mxu0  ;;  %v1137_v42 = vpop.f32.mrb[41].mxu1  ;;  %v354_v30 = vld [vmem:[#allocation2 + $0x1c8] sm:$0xff] }
 0x154   : > { %1562 = vst.msk [vmem:[%s2309_s21 + $0x188] sm:$0xff] %vm232_vm3, %v1498_v33  ;;  %v1332_v43 = vld [vmem:[#allocation2 + $0x90] sm:$0xff]  ;;  %v1010_v45 = vpop.f32.mrb[42].mxu0  ;;  %v1138_v46 = vpop.f32.mrb[42].mxu1 }
 0x155   : > { %v1364_v44 = vld [vmem:[#allocation2 + $0x190] sm:$0xff]  ;;  %v1403_v47 = vadd.f32 %v2298_v34, %v1332_v43  ;;  %1267 = vst.msk [vmem:[#allocation2 + $0xa0] sm:$0xff] %vm232_vm3, %v1202_v39  ;;  %1299 = vst.msk [vmem:[#allocation2 + $0x1a0] sm:$0xff] %vm232_vm3, %v1234_v40  ;;  %v1203_v49 = vadd.f32 %v1010_v45, %v318_v37  ;;  %v1235_v50 = vadd.f32 %v1138_v46, %v350_v38  ;;  %v1012_v51 = vpop.f32.mrb[43].mxu0  ;;  %v1140_v52 = vpop.f32.mrb[43].mxu1 }
 0x156   : > { %v1435_v48 = vadd.f32 %v2298_v34, %v1364_v44  ;;  %v1333_v53 = vld [vmem:[#allocation2 + $0x98] sm:$0xff]  ;;  %v323_v52 = vld [vmem:[#allocation2 + $0xd0] sm:$0xff] }
 0x157   : > { %v1365_v54 = vld [vmem:[#allocation2 + $0x198] sm:$0xff]  ;;  %v1467_v55 = vmax.f32 %v1403_v47, 0.0  ;;  %v1404_v57 = vadd.f32 %v2298_v34, %v1333_v53  ;;  %1268 = vst.msk [vmem:[#allocation2 + $0xa8] sm:$0xff] %vm232_vm3, %v1203_v49  ;;  %1300 = vst.msk [vmem:[#allocation2 + $0x1a8] sm:$0xff] %vm232_vm3, %v1235_v50  ;;  %v355_v53 = vld [vmem:[#allocation2 + $0x1d0] sm:$0xff] }
 0x158   : > { %v1499_v56 = vmax.f32 %v1435_v48, 0.0  ;;  %v1436_v58 = vadd.f32 %v2298_v34, %v1365_v54 }
 0x159   : > { %1531 = vst.msk [vmem:[%s2309_s21 + $0x90] sm:$0xff] %vm232_vm3, %v1467_v55  ;;  %v1468_v61 = vmax.f32 %v1404_v57, 0.0 }
 0x15a   : > { %1563 = vst.msk [vmem:[%s2309_s21 + $0x190] sm:$0xff] %vm232_vm3, %v1499_v56  ;;  %v1500_v62 = vmax.f32 %v1436_v58, 0.0  ;;  %v1015_v63 = vpop.f32.mrb[44].mxu0  ;;  %v1143_v0 = vpop.f32.mrb[44].mxu1  ;;  %v324_v58 = vld [vmem:[#allocation2 + $0xd8] sm:$0xff] }
 0x15b   : > { %1532 = vst.msk [vmem:[%s2309_s21 + $0x98] sm:$0xff] %vm232_vm3, %v1468_v61  ;;  %v1204_v3 = vadd.f32 %v1015_v63, %v319_v59  ;;  %v1236_v4 = vadd.f32 %v1143_v0, %v351_v60  ;;  %v1017_v5 = vpop.f32.mrb[45].mxu0  ;;  %v1145_v6 = vpop.f32.mrb[45].mxu1  ;;  %v356_v59 = vld [vmem:[#allocation2 + $0x1d8] sm:$0xff] }
 0x15c   : > { %1564 = vst.msk [vmem:[%s2309_s21 + $0x198] sm:$0xff] %vm232_vm3, %v1500_v62  ;;  %v1334_v7 = vld [vmem:[#allocation2 + $0xa0] sm:$0xff]  ;;  %v1018_v9 = vpop.f32.mrb[46].mxu0  ;;  %v1146_v10 = vpop.f32.mrb[46].mxu1 }
 0x15d   : > { %v1366_v8 = vld [vmem:[#allocation2 + $0x1a0] sm:$0xff]  ;;  %v1405_v11 = vadd.f32 %v2298_v34, %v1334_v7  ;;  %1269 = vst.msk [vmem:[#allocation2 + $0xb0] sm:$0xff] %vm232_vm3, %v1204_v3  ;;  %1301 = vst.msk [vmem:[#allocation2 + $0x1b0] sm:$0xff] %vm232_vm3, %v1236_v4  ;;  %v1205_v13 = vadd.f32 %v1018_v9, %v320_v1  ;;  %v1237_v14 = vadd.f32 %v1146_v10, %v352_v2  ;;  %v1020_v15 = vpop.f32.mrb[47].mxu0  ;;  %v1148_v16 = vpop.f32.mrb[47].mxu1 }
 0x15e   : > { %v1437_v12 = vadd.f32 %v2298_v34, %v1366_v8  ;;  %v1335_v17 = vld [vmem:[#allocation2 + $0xa8] sm:$0xff]  ;;  %v325_v16 = vld [vmem:[#allocation2 + $0xe0] sm:$0xff] }
 0x15f   : > { %v1367_v18 = vld [vmem:[#allocation2 + $0x1a8] sm:$0xff]  ;;  %v1469_v19 = vmax.f32 %v1405_v11, 0.0  ;;  %v1406_v21 = vadd.f32 %v2298_v34, %v1335_v17  ;;  %1270 = vst.msk [vmem:[#allocation2 + $0xb8] sm:$0xff] %vm232_vm3, %v1205_v13  ;;  %1302 = vst.msk [vmem:[#allocation2 + $0x1b8] sm:$0xff] %vm232_vm3, %v1237_v14  ;;  %v357_v17 = vld [vmem:[#allocation2 + $0x1e0] sm:$0xff] }
 0x160   : > { %v1501_v20 = vmax.f32 %v1437_v12, 0.0  ;;  %v1438_v22 = vadd.f32 %v2298_v34, %v1367_v18 }
 0x161   : > { %1533 = vst.msk [vmem:[%s2309_s21 + $0xa0] sm:$0xff] %vm232_vm3, %v1469_v19  ;;  %v1470_v25 = vmax.f32 %v1406_v21, 0.0 }
 0x162   : > { %1565 = vst.msk [vmem:[%s2309_s21 + $0x1a0] sm:$0xff] %vm232_vm3, %v1501_v20  ;;  %v1502_v26 = vmax.f32 %v1438_v22, 0.0  ;;  %v1023_v27 = vpop.f32.mrb[48].mxu0  ;;  %v1151_v28 = vpop.f32.mrb[48].mxu1  ;;  %v326_v22 = vld [vmem:[#allocation2 + $0xe8] sm:$0xff] }
 0x163   : > { %1534 = vst.msk [vmem:[%s2309_s21 + $0xa8] sm:$0xff] %vm232_vm3, %v1470_v25  ;;  %v1206_v31 = vadd.f32 %v1023_v27, %v321_v23  ;;  %v1238_v32 = vadd.f32 %v1151_v28, %v353_v24  ;;  %v1025_v33 = vpop.f32.mrb[49].mxu0  ;;  %v1153_v35 = vpop.f32.mrb[49].mxu1  ;;  %v358_v23 = vld [vmem:[#allocation2 + $0x1e8] sm:$0xff] }
 0x164   : > { %1566 = vst.msk [vmem:[%s2309_s21 + $0x1a8] sm:$0xff] %vm232_vm3, %v1502_v26  ;;  %v1336_v36 = vld [vmem:[#allocation2 + $0xb0] sm:$0xff]  ;;  %v1026_v38 = vpop.f32.mrb[50].mxu0  ;;  %v1154_v39 = vpop.f32.mrb[50].mxu1 }
 0x165   : > { %v1368_v37 = vld [vmem:[#allocation2 + $0x1b0] sm:$0xff]  ;;  %v1407_v40 = vadd.f32 %v2298_v34, %v1336_v36  ;;  %1271 = vst.msk [vmem:[#allocation2 + $0xc0] sm:$0xff] %vm232_vm3, %v1206_v31  ;;  %1303 = vst.msk [vmem:[#allocation2 + $0x1c0] sm:$0xff] %vm232_vm3, %v1238_v32  ;;  %v1207_v42 = vadd.f32 %v1026_v38, %v322_v29  ;;  %v1239_v43 = vadd.f32 %v1154_v39, %v354_v30  ;;  %v1028_v44 = vpop.f32.mrb[51].mxu0  ;;  %v1156_v45 = vpop.f32.mrb[51].mxu1 }
 0x166   : > { %v1439_v41 = vadd.f32 %v2298_v34, %v1368_v37  ;;  %v1337_v46 = vld [vmem:[#allocation2 + $0xb8] sm:$0xff]  ;;  %v327_v45 = vld [vmem:[#allocation2 + $0xf0] sm:$0xff] }
 0x167   : > { %v1369_v47 = vld [vmem:[#allocation2 + $0x1b8] sm:$0xff]  ;;  %v1471_v48 = vmax.f32 %v1407_v40, 0.0  ;;  %v1408_v50 = vadd.f32 %v2298_v34, %v1337_v46  ;;  %1272 = vst.msk [vmem:[#allocation2 + $0xc8] sm:$0xff] %vm232_vm3, %v1207_v42  ;;  %1304 = vst.msk [vmem:[#allocation2 + $0x1c8] sm:$0xff] %vm232_vm3, %v1239_v43  ;;  %v359_v46 = vld [vmem:[#allocation2 + $0x1f0] sm:$0xff] }
 0x168   : > { %v1503_v49 = vmax.f32 %v1439_v41, 0.0  ;;  %v1440_v51 = vadd.f32 %v2298_v34, %v1369_v47 }
 0x169   : > { %1535 = vst.msk [vmem:[%s2309_s21 + $0xb0] sm:$0xff] %vm232_vm3, %v1471_v48  ;;  %v1472_v54 = vmax.f32 %v1408_v50, 0.0 }
 0x16a   : > { %1567 = vst.msk [vmem:[%s2309_s21 + $0x1b0] sm:$0xff] %vm232_vm3, %v1503_v49  ;;  %v1504_v55 = vmax.f32 %v1440_v51, 0.0  ;;  %v1031_v56 = vpop.f32.mrb[52].mxu0  ;;  %v1159_v57 = vpop.f32.mrb[52].mxu1  ;;  %v328_v51 = vld [vmem:[#allocation2 + $0xf8] sm:$0xff] }
 0x16b   : > { %1536 = vst.msk [vmem:[%s2309_s21 + $0xb8] sm:$0xff] %vm232_vm3, %v1472_v54  ;;  %v1208_v60 = vadd.f32 %v1031_v56, %v323_v52  ;;  %v1240_v61 = vadd.f32 %v1159_v57, %v355_v53  ;;  %v1033_v62 = vpop.f32.mrb[53].mxu0  ;;  %v1161_v63 = vpop.f32.mrb[53].mxu1  ;;  %v360_v52 = vld [vmem:[#allocation2 + $0x1f8] sm:$0xff] }
 0x16c   : > { %1568 = vst.msk [vmem:[%s2309_s21 + $0x1b8] sm:$0xff] %vm232_vm3, %v1504_v55  ;;  %v1338_v0 = vld [vmem:[#allocation2 + $0xc0] sm:$0xff]  ;;  %v1034_v2 = vpop.f32.mrb[54].mxu0  ;;  %v1162_v3 = vpop.f32.mrb[54].mxu1 }
 0x16d   : > { %v1370_v1 = vld [vmem:[#allocation2 + $0x1c0] sm:$0xff]  ;;  %v1409_v4 = vadd.f32 %v2298_v34, %v1338_v0  ;;  %1273 = vst.msk [vmem:[#allocation2 + $0xd0] sm:$0xff] %vm232_vm3, %v1208_v60  ;;  %1305 = vst.msk [vmem:[#allocation2 + $0x1d0] sm:$0xff] %vm232_vm3, %v1240_v61  ;;  %v1209_v6 = vadd.f32 %v1034_v2, %v324_v58  ;;  %v1241_v7 = vadd.f32 %v1162_v3, %v356_v59  ;;  %v1036_v8 = vpop.f32.mrb[55].mxu0  ;;  %v1164_v9 = vpop.f32.mrb[55].mxu1 }
 0x16e   : > { %v1441_v5 = vadd.f32 %v2298_v34, %v1370_v1  ;;  %v1339_v10 = vld [vmem:[#allocation2 + $0xc8] sm:$0xff]  ;;  %v1937_v60 = vld [vmem:[%s2565_s2] ss:$0 sm:$0xff] }
 0x16f   : > { %v1371_v11 = vld [vmem:[#allocation2 + $0x1c8] sm:$0xff]  ;;  %v1473_v12 = vmax.f32 %v1409_v4, 0.0  ;;  %v1410_v14 = vadd.f32 %v2298_v34, %v1339_v10  ;;  %1274 = vst.msk [vmem:[#allocation2 + $0xd8] sm:$0xff] %vm232_vm3, %v1209_v6  ;;  %1306 = vst.msk [vmem:[#allocation2 + $0x1d8] sm:$0xff] %vm232_vm3, %v1241_v7 }
 0x170   : > { %v1505_v13 = vmax.f32 %v1441_v5, 0.0  ;;  %v1442_v15 = vadd.f32 %v2298_v34, %v1371_v11 }
 0x171   : > { %1537 = vst.msk [vmem:[%s2309_s21 + $0xc0] sm:$0xff] %vm232_vm3, %v1473_v12  ;;  %v1474_v18 = vmax.f32 %v1410_v14, 0.0 }
 0x172   : > { %1569 = vst.msk [vmem:[%s2309_s21 + $0x1c0] sm:$0xff] %vm232_vm3, %v1505_v13  ;;  %v1506_v19 = vmax.f32 %v1442_v15, 0.0  ;;  %v1039_v20 = vpop.f32.mrb[56].mxu0  ;;  %v1167_v21 = vpop.f32.mrb[56].mxu1 }
 0x173   : > { %1538 = vst.msk [vmem:[%s2309_s21 + $0xc8] sm:$0xff] %vm232_vm3, %v1474_v18  ;;  %v1210_v24 = vadd.f32 %v1039_v20, %v325_v16  ;;  %v1242_v25 = vadd.f32 %v1167_v21, %v357_v17  ;;  %v1041_v26 = vpop.f32.mrb[57].mxu0  ;;  %v1169_v27 = vpop.f32.mrb[57].mxu1 }
 0x174   : > { %1570 = vst.msk [vmem:[%s2309_s21 + $0x1c8] sm:$0xff] %vm232_vm3, %v1506_v19  ;;  %v1340_v28 = vld [vmem:[#allocation2 + $0xd0] sm:$0xff]  ;;  %v1042_v30 = vpop.f32.mrb[58].mxu0  ;;  %v1170_v31 = vpop.f32.mrb[58].mxu1 }
 0x175   : > { %v1372_v29 = vld [vmem:[#allocation2 + $0x1d0] sm:$0xff]  ;;  %v1411_v32 = vadd.f32 %v2298_v34, %v1340_v28  ;;  %1275 = vst.msk [vmem:[#allocation2 + $0xe0] sm:$0xff] %vm232_vm3, %v1210_v24  ;;  %1307 = vst.msk [vmem:[#allocation2 + $0x1e0] sm:$0xff] %vm232_vm3, %v1242_v25  ;;  %v1211_v35 = vadd.f32 %v1042_v30, %v326_v22  ;;  %v1243_v36 = vadd.f32 %v1170_v31, %v358_v23  ;;  %v1044_v37 = vpop.f32.mrb[59].mxu0  ;;  %v1172_v38 = vpop.f32.mrb[59].mxu1 }
 0x176   : > { %v1443_v33 = vadd.f32 %v2298_v34, %v1372_v29  ;;  %v1341_v39 = vld [vmem:[#allocation2 + $0xd8] sm:$0xff] }
 0x177   : > { %v1373_v40 = vld [vmem:[#allocation2 + $0x1d8] sm:$0xff]  ;;  %v1475_v41 = vmax.f32 %v1411_v32, 0.0  ;;  %v1412_v43 = vadd.f32 %v2298_v34, %v1341_v39  ;;  %1276 = vst.msk [vmem:[#allocation2 + $0xe8] sm:$0xff] %vm232_vm3, %v1211_v35  ;;  %1308 = vst.msk [vmem:[#allocation2 + $0x1e8] sm:$0xff] %vm232_vm3, %v1243_v36 }
 0x178   : > { %v1507_v42 = vmax.f32 %v1443_v33, 0.0  ;;  %v1444_v44 = vadd.f32 %v2298_v34, %v1373_v40 }
 0x179   : > { %1539 = vst.msk [vmem:[%s2309_s21 + $0xd0] sm:$0xff] %vm232_vm3, %v1475_v41  ;;  %v1476_v47 = vmax.f32 %v1412_v43, 0.0 }
 0x17a   : > { %1571 = vst.msk [vmem:[%s2309_s21 + $0x1d0] sm:$0xff] %vm232_vm3, %v1507_v42  ;;  %v1508_v48 = vmax.f32 %v1444_v44, 0.0  ;;  %v1047_v49 = vpop.f32.mrb[60].mxu0  ;;  %v1175_v50 = vpop.f32.mrb[60].mxu1 }
 0x17b   : > { %1540 = vst.msk [vmem:[%s2309_s21 + $0xd8] sm:$0xff] %vm232_vm3, %v1476_v47  ;;  %v1212_v34 = vadd.f32 %v1047_v49, %v327_v45  ;;  %v1244_v53 = vadd.f32 %v1175_v50, %v359_v46  ;;  %v1049_v54 = vpop.f32.mrb[61].mxu0  ;;  %v1177_v55 = vpop.f32.mrb[61].mxu1 }
 0x17c   : > { %1572 = vst.msk [vmem:[%s2309_s21 + $0x1d8] sm:$0xff] %vm232_vm3, %v1508_v48  ;;  %v1342_v56 = vld [vmem:[#allocation2 + $0xe0] sm:$0xff]  ;;  %v1050_v58 = vpop.f32.mrb[62].mxu0  ;;  %v1178_v59 = vpop.f32.mrb[62].mxu1 }
 0x17d   : > { %v1374_v57 = vld [vmem:[#allocation2 + $0x1e0] sm:$0xff]  ;;  %v1413_v61 = vadd.f32 %v1937_v60, %v1342_v56  ;;  %1277 = vst.msk [vmem:[#allocation2 + $0xf0] sm:$0xff] %vm232_vm3, %v1212_v34  ;;  %1309 = vst.msk [vmem:[#allocation2 + $0x1f0] sm:$0xff] %vm232_vm3, %v1244_v53  ;;  %v1213_v63 = vadd.f32 %v1050_v58, %v328_v51  ;;  %v1245_v0 = vadd.f32 %v1178_v59, %v360_v52  ;;  %v1052_v1 = vpop.f32.mrb[63].mxu0  ;;  %v1180_v2 = vpop.f32.mrb[63].mxu1 }
 0x17e   : > { %v1445_v62 = vadd.f32 %v1937_v60, %v1374_v57  ;;  %v1343_v3 = vld [vmem:[#allocation2 + $0xe8] sm:$0xff] }
 0x17f   : > { %v1375_v4 = vld [vmem:[#allocation2 + $0x1e8] sm:$0xff]  ;;  %v1477_v5 = vmax.f32 %v1413_v61, 0.0  ;;  %v1414_v7 = vadd.f32 %v1937_v60, %v1343_v3  ;;  %1278 = vst.msk [vmem:[#allocation2 + $0xf8] sm:$0xff] %vm232_vm3, %v1213_v63  ;;  %1310 = vst.msk [vmem:[#allocation2 + $0x1f8] sm:$0xff] %vm232_vm3, %v1245_v0 }
 0x180   : > { %v1509_v6 = vmax.f32 %v1445_v62, 0.0  ;;  %v1446_v8 = vadd.f32 %v1937_v60, %v1375_v4 }
 0x181   : > { %1541 = vst.msk [vmem:[%s2309_s21 + $0xe0] sm:$0xff] %vm232_vm3, %v1477_v5  ;;  %v1478_v9 = vmax.f32 %v1414_v7, 0.0 }
 0x182   : > { %1573 = vst.msk [vmem:[%s2309_s21 + $0x1e0] sm:$0xff] %vm232_vm3, %v1509_v6  ;;  %v1510_v10 = vmax.f32 %v1446_v8, 0.0 }
 0x183   : > { %1542 = vst.msk [vmem:[%s2309_s21 + $0xe8] sm:$0xff] %vm232_vm3, %v1478_v9 }
 0x184   : > { %1574 = vst.msk [vmem:[%s2309_s21 + $0x1e8] sm:$0xff] %vm232_vm3, %v1510_v10  ;;  %v1344_v11 = vld [vmem:[#allocation2 + $0xf0] sm:$0xff] }
 0x185   : > { %v1376_v12 = vld [vmem:[#allocation2 + $0x1f0] sm:$0xff]  ;;  %v1415_v13 = vadd.f32 %v1937_v60, %v1344_v11 }
 0x186   : > { %v1447_v14 = vadd.f32 %v1937_v60, %v1376_v12  ;;  %v1345_v15 = vld [vmem:[#allocation2 + $0xf8] sm:$0xff] }
 0x187   : > { %v1377_v16 = vld [vmem:[#allocation2 + $0x1f8] sm:$0xff]  ;;  %v1479_v17 = vmax.f32 %v1415_v13, 0.0  ;;  %v1416_v19 = vadd.f32 %v1937_v60, %v1345_v15 }
 0x188   : > { %v1511_v18 = vmax.f32 %v1447_v14, 0.0  ;;  %v1448_v20 = vadd.f32 %v1937_v60, %v1377_v16 }
 0x189   : > { %1543 = vst.msk [vmem:[%s2309_s21 + $0xf0] sm:$0xff] %vm232_vm3, %v1479_v17  ;;  %v1480_v21 = vmax.f32 %v1416_v19, 0.0 }
 0x18a   : > { %1575 = vst.msk [vmem:[%s2309_s21 + $0x1f0] sm:$0xff] %vm232_vm3, %v1511_v18  ;;  %v1512_v22 = vmax.f32 %v1448_v20, 0.0 }
 0x18b   : > { %1544 = vst.msk [vmem:[%s2309_s21 + $0xf8] sm:$0xff] %vm232_vm3, %v1480_v21 }
 0x18c   : > { %1576 = vst.msk [vmem:[%s2309_s21 + $0x1f8] sm:$0xff] %vm232_vm3, %v1512_v22 }
 0x18d PF: > { %s13_s14 = sadd.s32 1, %s1960_s14   ;;  %s2567_s12 = smov %s1956_s13 }
 0x18e   : > { %p10_p5 = scmp.ge.s32.totalorder %s13_s14, 6   ;;  %s2568_s13 = smov %s2570_s15 }
 0x190   :  { %12 = sbr.rel (!%p10_p5) target bundleno = 2 (0x2), region = 73 }

</bundles_post_ra>
